<compile_context>
chip_gen: v7x
topology: tpu7x:2x2x1
jax: 0.10.0
libtpu: 0.0.40
codegen_flags: <defaults>
</compile_context>

<pallas_src>
import jax
import jax.numpy as jnp
from jax import lax
from jax.experimental import pallas as pl
from jax.experimental.pallas import tpu as pltpu


def _round_up(x, m):
    return (x + m - 1) // m * m


def _make_kernel(B, H, W, W_pad, Cin, P, has_downsample):
    """Fused bottleneck kernel for B images per grid step."""
    HW = H * W
    HWp = H * W_pad

    def kernel(x_ref, w1d_ref, b1d_ref, w2_ref, b23_ref, w3_ref, o_ref, pad_ref):
        x2 = x_ref[...].reshape(B * HW, Cin)                  # (B*HW, Cin) bf16

        # ---- conv1 (1x1) fused with downsample 1x1: one wide matmul ----
        # BN scales are folded into the bf16 weights; only the bias remains.
        t = jnp.dot(x2, w1d_ref[...], preferred_element_type=jnp.float32)
        t = t + b1d_ref[...]
        if has_downsample:
            t1 = jnp.maximum(t[:, :P], 0.0)                   # conv1+bn1+relu
            d_bf = t[:, P:].astype(jnp.bfloat16)              # shortcut, bf16 halves live bytes
        else:
            t1 = jnp.maximum(t, 0.0)

        # ---- stage t1: three column-shifted copies stacked on the lane axis ----
        # pad_ref[b] layout: rows 0:2 / H+2:H+4 are zero halos, rows 2:2+H hold
        # t1; lane block kx*P:(kx+1)*P holds the copy shifted by (2*kx - 2)
        # columns, so every ky tap is one contiguous (H, W_pad, 3P) window.
        t1b = t1.reshape(B, H, W, P).astype(pad_ref.dtype)
        zrow = jnp.zeros((2, W_pad, 3 * P), pad_ref.dtype)
        zc2 = jnp.zeros((H, 2, P), pad_ref.dtype)

        def fit_w(a):                                          # -> (H, W_pad, P)
            w = a.shape[1]
            if w == W_pad:
                return a
            if w > W_pad:
                return a[:, :W_pad, :]
            return jnp.concatenate(
                [a, jnp.zeros((H, W_pad - w, P), pad_ref.dtype)], axis=1)

        for b in range(B):
            tb = t1b[b]                                        # (H, W, P)
            p0 = fit_w(jnp.concatenate([zc2, tb], axis=1))             # kx=0: shift right 2
            p1 = fit_w(tb)                                             # kx=1: no shift
            p2 = fit_w(jnp.concatenate([tb[:, 2:, :], zc2], axis=1))   # kx=2: shift left 2
            staged = jnp.concatenate([p0, p1, p2], axis=-1)            # (H, W_pad, 3P)
            # One full store per image: row halos included -> no masked strips.
            pad_ref[b] = jnp.concatenate([zrow, staged, zrow], axis=0)

        # ---- conv2: 3 contiguous (HWp, 3P) x (3P, P) matmuls (one per ky) ----
        w2k = [w2_ref[ky] for ky in range(3)]                  # hoisted weight loads
        per_img = []
        for b in range(B):
            acc_b = None
            for ky in range(3):
                win = pad_ref[b, 2 * ky:2 * ky + H]            # (H, W_pad, 3P) contiguous
                mm = jnp.dot(win.reshape(HWp, 3 * P), w2k[ky],
                             preferred_element_type=jnp.float32)
                acc_b = mm if acc_b is None else acc_b + mm    # chained sum (MRB-friendly)
            per_img.append(acc_b)
        acc = per_img[0] if B == 1 else jnp.concatenate(per_img, axis=0)

        # ---- bn2 (bias) + relu ; conv3 (1x1) + bn3 (bias) ----
        t2 = jnp.maximum(acc + b23_ref[0:1, :], 0.0)           # (B*HWp, P) f32
        t3 = jnp.dot(t2.astype(jnp.bfloat16), w3_ref[...],
                     preferred_element_type=jnp.float32) + b23_ref[1:2, :]
        if W_pad != W:
            t3 = t3.reshape(B, H, W_pad, P)[:, :, :W, :].reshape(B * HW, P)

        # ---- residual add + relu, lane-dense store ----
        if has_downsample:
            d = d_bf.astype(jnp.float32)
        else:
            d = x_ref[...].reshape(B * HW, Cin).astype(jnp.float32)   # re-read resident block
        o_ref[...] = jnp.maximum(t3 + d, 0.0).reshape(B, HW, P).astype(o_ref.dtype)

    return kernel


def _pick_image_block(N, H, W_pad, Cin, P, wcols):
    """Images per grid step: largest divisor of N within a conservative budget."""
    per_img = (H * W_pad * (wcols + 3 * P) * 4          # live f32 temporaries
               + (H + 4) * W_pad * 3 * P * 2            # staging scratch (bf16)
               + 2 * H * W_pad * Cin * 2                # input block (double-buffered)
               + 2 * H * W_pad * P * 4)                 # output block (double-buffered)
    budget = 24 * 1024 * 1024
    max_b = int(max(1, min(8, budget // max(per_img, 1))))
    best = 1
    for cand in range(1, min(N, max_b) + 1):
        if N % cand == 0:
            best = cand
    return best


def _vmem_limit_bytes(B, H, W, W_pad, Cin, P, wcols):
    """Honest scoped-VMEM budget (no double counting) with a generation-aware cap."""
    hw, hwp = H * W, H * W_pad
    io = 2 * B * hw * Cin * 2 + 2 * B * hw * P * 4               # double-buffered I/O
    weights = 2 * ((Cin * wcols + 9 * P * P + P * P) * 2 + (wcols + 2 * P) * 4)
    scratch = B * (H + 4) * W_pad * 3 * P * 2
    temps = B * hwp * (wcols + 3 * P) * 4 + B * hw * P * 2       # live f32 temps + bf16 shortcut
    est = int((io + weights + scratch + temps) * 1.5)            # compiler headroom
    try:
        # ~48 MiB on v7x (64 MiB physical), ~96 MiB on v5e/v6e (128 MiB physical)
        cap = int(pltpu.get_tpu_info().vmem_capacity_bytes * 3 // 4)
    except Exception:
        cap = 48 * 1024 * 1024
    return int(min(max(est, 8 * 1024 * 1024), cap))


def detnet_bottleneck_pallas(x_nhwc, kparams):
    """x_nhwc: (N, H, W, Cin) float32. Returns (N, H, W, P) float32."""
    N, H, W, Cin = x_nhwc.shape
    P = kparams["P"]
    has_downsample = kparams["has_downsample"]
    wcols = kparams["w1d"].shape[1]
    W_pad = _round_up(W, 8)
    B = _pick_image_block(N, H, W_pad, Cin, P, wcols)

    # Lane-dense input slab; matmul operand cast to bf16 on the host.
    x_flat = x_nhwc.reshape(N, H * W, Cin).astype(jnp.bfloat16)

    kernel = _make_kernel(B, H, W, W_pad, Cin, P, has_downsample)

    in_specs = [
        pl.BlockSpec((B, H * W, Cin), lambda n: (n, 0, 0)),      # x
        pl.BlockSpec((Cin, wcols), lambda n: (0, 0)),            # w1 | wd (scale-folded)
        pl.BlockSpec((1, wcols), lambda n: (0, 0)),              # b1 | bd
        pl.BlockSpec((3, 3 * P, P), lambda n: (0, 0, 0)),        # w2 packed per ky
        pl.BlockSpec((2, P), lambda n: (0, 0)),                  # [b2; b3]
        pl.BlockSpec((P, P), lambda n: (0, 0)),                  # w3 (scale-folded)
    ]

    out_flat = pl.pallas_call(
        kernel,
        out_shape=jax.ShapeDtypeStruct((N, H * W, P), jnp.float32),
        grid=(N // B,),
        in_specs=in_specs,
        out_specs=pl.BlockSpec((B, H * W, P), lambda n: (n, 0, 0)),
        scratch_shapes=[pltpu.VMEM((B, H + 4, W_pad, 3 * P), jnp.bfloat16)],
        compiler_params=pltpu.CompilerParams(
            dimension_semantics=("parallel",),
            vmem_limit_bytes=_vmem_limit_bytes(B, H, W, W_pad, Cin, P, wcols)),
    )(
        x_flat,
        kparams["w1d"], kparams["b1d"],
        kparams["w2"], kparams["b23"], kparams["w3"],
    )
    return out_flat.reshape(N, H, W, P)


def fold_bn(gamma, beta, mean, var, eps=1e-5):
    scale = gamma / jnp.sqrt(var + eps)
    bias = beta - mean * scale
    return scale.reshape(1, -1), bias.reshape(1, -1)


def init_params(key, in_planes, planes, block_type="A", stride=1):
    """Deterministic synthetic params matching detnet_bottleneck.__init__ shapes."""
    assert stride == 1, "only stride=1 supported by this kernel"
    ks = jax.random.split(key, 8)

    def conv1x1(k, cin, cout):
        # PyTorch weight (cout, cin, 1, 1) -> (cin, cout) matmul form
        return jax.random.normal(k, (cin, cout), jnp.float32) * 0.1

    def bn_params(k, c):
        k1, k2, k3, k4 = jax.random.split(k, 4)
        gamma = 1.0 + 0.1 * jax.random.normal(k1, (c,), jnp.float32)
        beta = 0.1 * jax.random.normal(k2, (c,), jnp.float32)
        mean = 0.1 * jax.random.normal(k3, (c,), jnp.float32)
        var = jnp.abs(jax.random.normal(k4, (c,), jnp.float32)) + 0.5
        return fold_bn(gamma, beta, mean, var)

    p = {}
    p["w1"] = conv1x1(ks[0], in_planes, planes)
    p["s1"], p["b1"] = bn_params(ks[1], planes)
    # conv2 weights stored HWIO: (3, 3, in=planes, out=planes)
    p["w2"] = jax.random.normal(ks[2], (3, 3, planes, planes), jnp.float32) * 0.05
    p["s2"], p["b2"] = bn_params(ks[3], planes)
    p["w3"] = conv1x1(ks[4], planes, planes)
    p["s3"], p["b3"] = bn_params(ks[5], planes)

    p["has_downsample"] = (stride != 1) or (in_planes != planes) or (block_type == "B")
    if p["has_downsample"]:
        p["wd"] = conv1x1(ks[6], in_planes, planes)
        p["sd"], p["bd"] = bn_params(ks[7], planes)
    return p


def prepare_kernel_params(p):
    """Fold BN scales into bf16 weights, fuse conv1|downsample, pack w2 per-ky."""
    P = p["w3"].shape[1]
    kp = {"P": P, "has_downsample": p["has_downsample"]}

    w1 = p["w1"] * p["s1"]                                   # fold bn1 scale
    if p["has_downsample"]:
        wd = p["wd"] * p["sd"]                               # fold bnd scale
        kp["w1d"] = jnp.concatenate([w1, wd], axis=1).astype(jnp.bfloat16)
        kp["b1d"] = jnp.concatenate([p["b1"], p["bd"]], axis=1)
    else:
        assert p["w1"].shape[0] == P, \
            "identity shortcut only valid when in_planes == planes"
        kp["w1d"] = w1.astype(jnp.bfloat16)
        kp["b1d"] = p["b1"]

    # conv2 HWIO (3,3,P,P): fold bn2 scale over the output channel, then stack
    # the three kx weights along the input axis -> (3, 3P, P), one per ky.
    w2 = p["w2"] * p["s2"].reshape(1, 1, 1, P)
    w2_packed = jnp.stack(
        [jnp.concatenate([w2[ky, 0], w2[ky, 1], w2[ky, 2]], axis=0)
         for ky in range(3)], axis=0)
    kp["w2"] = w2_packed.astype(jnp.bfloat16)

    kp["w3"] = (p["w3"] * p["s3"]).astype(jnp.bfloat16)      # fold bn3 scale
    kp["b23"] = jnp.concatenate([p["b2"], p["b3"]], axis=0)  # (2, P): [b2; b3]
    return kp


def reference_forward(x_nhwc, p):
    """Pure-JAX f32 reference (same folded-BN inference semantics)."""
    def c1x1(x, w):
        return jnp.einsum("nhwc,cd->nhwd", x, w)

    t = jax.nn.relu(c1x1(x_nhwc, p["w1"]) * p["s1"] + p["b1"])
    t2 = lax.conv_general_dilated(
        t, p["w2"], window_strides=(1, 1), padding=((2, 2), (2, 2)),
        rhs_dilation=(2, 2), dimension_numbers=("NHWC", "HWIO", "NHWC"))
    t2 = jax.nn.relu(t2 * p["s2"] + p["b2"])
    t3 = c1x1(t2, p["w3"]) * p["s3"] + p["b3"]
    if p["has_downsample"]:
        d = c1x1(x_nhwc, p["wd"]) * p["sd"] + p["bd"]
    else:
        d = x_nhwc
    return jax.nn.relu(t3 + d)


if __name__ == "__main__":
    key = jax.random.PRNGKey(0)
    kx, kp = jax.random.split(key)

    N, Cin, H, W = 2, 4, 16, 16        # NCHW, as PyTorch would see it
    planes = 8                          # in_planes != planes -> downsample active
    x_nchw = jax.random.normal(kx, (N, Cin, H, W), jnp.float32)
    x_nhwc = jnp.transpose(x_nchw, (0, 2, 3, 1))

    params = init_params(kp, in_planes=Cin, planes=planes, block_type="A", stride=1)
    kparams = prepare_kernel_params(params)

    out_nhwc = detnet_bottleneck_pallas(x_nhwc, kparams)
    out_nhwc = jax.block_until_ready(out_nhwc)
    out_nchw = jnp.transpose(out_nhwc, (0, 3, 1, 2))   # back to PyTorch NCHW

    ref = reference_forward(x_nhwc, params)
    assert out_nhwc.shape == (N, H, W, planes)
    assert out_nchw.shape == (N, planes, H, W)
    # bf16 matmul operands / scale-folded bf16 weights vs pure-f32 reference.
    max_err = float(jnp.max(jnp.abs(out_nhwc - ref)))
    assert jnp.allclose(out_nhwc, ref, rtol=2e-2, atol=2e-2), max_err

    print("KERNEL_OK")
</pallas_src>

<mosaic_0001>
module attributes {stable_mosaic.version = 11 : i64} {
  func.func @kernel(%arg0: i32, %arg1: memref<2x256x4xbf16, #tpu.memory_space<vmem>>, %arg2: memref<4x16xbf16, #tpu.memory_space<vmem>>, %arg3: memref<1x16xf32, #tpu.memory_space<vmem>>, %arg4: memref<3x24x8xbf16, #tpu.memory_space<vmem>>, %arg5: memref<2x8xf32, #tpu.memory_space<vmem>>, %arg6: memref<8x8xbf16, #tpu.memory_space<vmem>>, %arg7: memref<2x256x8xf32, #tpu.memory_space<vmem>>, %arg8: memref<2x20x16x24xbf16, #tpu.memory_space<vmem>>) attributes {dimension_semantics = [#tpu.dimension_semantics<parallel>], iteration_bounds = array<i64: 1>, scalar_prefetch = 0 : i64, scratch_operands = 1 : i64, tpu.core_type = #tpu.core_type<tc>, window_params = [{transform_indices = @transform_0, window_bounds = array<i64: 2, 256, 4>}, {pipeline_mode = #tpu.pipeline_mode<synchronous>, transform_indices = @transform_1, window_bounds = array<i64: 4, 16>}, {pipeline_mode = #tpu.pipeline_mode<synchronous>, transform_indices = @transform_2, window_bounds = array<i64: 1, 16>}, {pipeline_mode = #tpu.pipeline_mode<synchronous>, transform_indices = @transform_3, window_bounds = array<i64: 3, 24, 8>}, {pipeline_mode = #tpu.pipeline_mode<synchronous>, transform_indices = @transform_4, window_bounds = array<i64: 2, 8>}, {pipeline_mode = #tpu.pipeline_mode<synchronous>, transform_indices = @transform_5, window_bounds = array<i64: 8, 8>}, {transform_indices = @transform_6, window_bounds = array<i64: 2, 256, 8>}]} {
    %c0 = arith.constant 0 : index
    %c0_0 = arith.constant 0 : index
    %c0_1 = arith.constant 0 : index
    %0 = vector.load %arg1[%c0, %c0_0, %c0_1] : memref<2x256x4xbf16, #tpu.memory_space<vmem>>, vector<2x256x4xbf16>
    %1 = vector.shape_cast %0 : vector<2x256x4xbf16> to vector<512x4xbf16>
    %c0_2 = arith.constant 0 : index
    %c0_3 = arith.constant 0 : index
    %2 = vector.load %arg2[%c0_2, %c0_3] : memref<4x16xbf16, #tpu.memory_space<vmem>>, vector<4x16xbf16>
    %cst = arith.constant dense<0.000000e+00> : vector<512x16xf32>
    %3 = tpu.matmul %1, %2, %cst {dimension_numbers = #tpu.dot_dimension_numbers<[1], [0], [0], [1], [0, 0, 1, 1], [], []>} : vector<512x4xbf16>, vector<4x16xbf16>, vector<512x16xf32> -> vector<512x16xf32>
    %c0_4 = arith.constant 0 : index
    %c0_5 = arith.constant 0 : index
    %4 = vector.load %arg3[%c0_4, %c0_5] : memref<1x16xf32, #tpu.memory_space<vmem>>, vector<1x16xf32>
    %5 = vector.broadcast %4 : vector<1x16xf32> to vector<512x16xf32>
    %6 = arith.addf %3, %5 : vector<512x16xf32>
    %7 = vector.extract_strided_slice %6 {offsets = [0, 0], sizes = [512, 8], strides = [1, 1]} : vector<512x16xf32> to vector<512x8xf32>
    %cst_6 = arith.constant 0.000000e+00 : f32
    %8 = vector.broadcast %cst_6 : f32 to vector<512x8xf32>
    %9 = arith.maximumf %7, %8 : vector<512x8xf32>
    %10 = vector.extract_strided_slice %6 {offsets = [0, 8], sizes = [512, 8], strides = [1, 1]} : vector<512x16xf32> to vector<512x8xf32>
    %11 = arith.truncf %10 : vector<512x8xf32> to vector<512x8xbf16>
    %12 = vector.shape_cast %9 : vector<512x8xf32> to vector<2x16x16x8xf32>
    %13 = arith.truncf %12 : vector<2x16x16x8xf32> to vector<2x16x16x8xbf16>
    %cst_7 = arith.constant 0.000000e+00 : bf16
    %14 = vector.broadcast %cst_7 : bf16 to vector<2x16x24xbf16>
    %cst_8 = arith.constant 0.000000e+00 : bf16
    %15 = vector.broadcast %cst_8 : bf16 to vector<16x2x8xbf16>
    %16 = vector.extract_strided_slice %13 {offsets = [0, 0, 0, 0], sizes = [1, 16, 16, 8], strides = [1, 1, 1, 1]} : vector<2x16x16x8xbf16> to vector<1x16x16x8xbf16>
    %17 = vector.shape_cast %16 : vector<1x16x16x8xbf16> to vector<16x16x8xbf16>
    %18 = tpu.concatenate %15, %17 in 1 : vector<16x2x8xbf16>, vector<16x16x8xbf16> -> vector<16x18x8xbf16>
    %19 = vector.extract_strided_slice %18 {offsets = [0, 0, 0], sizes = [16, 16, 8], strides = [1, 1, 1]} : vector<16x18x8xbf16> to vector<16x16x8xbf16>
    %20 = vector.extract_strided_slice %17 {offsets = [0, 2, 0], sizes = [16, 14, 8], strides = [1, 1, 1]} : vector<16x16x8xbf16> to vector<16x14x8xbf16>
    %21 = tpu.concatenate %20, %15 in 1 : vector<16x14x8xbf16>, vector<16x2x8xbf16> -> vector<16x16x8xbf16>
    %22 = tpu.concatenate %19, %17, %21 in 2 : vector<16x16x8xbf16>, vector<16x16x8xbf16>, vector<16x16x8xbf16> -> vector<16x16x24xbf16>
    %23 = tpu.concatenate %14, %22, %14 in 0 : vector<2x16x24xbf16>, vector<16x16x24xbf16>, vector<2x16x24xbf16> -> vector<20x16x24xbf16>
    %c0_9 = arith.constant 0 : index
    %c0_10 = arith.constant 0 : index
    %c0_11 = arith.constant 0 : index
    %c0_12 = arith.constant 0 : index
    %24 = vector.load %arg8[%c0_9, %c0_10, %c0_11, %c0_12] : memref<2x20x16x24xbf16, #tpu.memory_space<vmem>>, vector<1x20x16x24xbf16>
    %25 = vector.shape_cast %24 : vector<1x20x16x24xbf16> to vector<20x16x24xbf16>
    %26 = vector.shape_cast %23 : vector<20x16x24xbf16> to vector<1x20x16x24xbf16>
    tpu.vector_store %arg8[%c0_9, %c0_10, %c0_11, %c0_12], %26 {strides = array<i32>} : memref<2x20x16x24xbf16, #tpu.memory_space<vmem>>, vector<1x20x16x24xbf16>,
    %27 = vector.extract_strided_slice %13 {offsets = [1, 0, 0, 0], sizes = [1, 16, 16, 8], strides = [1, 1, 1, 1]} : vector<2x16x16x8xbf16> to vector<1x16x16x8xbf16>
    %28 = vector.shape_cast %27 : vector<1x16x16x8xbf16> to vector<16x16x8xbf16>
    %29 = tpu.concatenate %15, %28 in 1 : vector<16x2x8xbf16>, vector<16x16x8xbf16> -> vector<16x18x8xbf16>
    %30 = vector.extract_strided_slice %29 {offsets = [0, 0, 0], sizes = [16, 16, 8], strides = [1, 1, 1]} : vector<16x18x8xbf16> to vector<16x16x8xbf16>
    %31 = vector.extract_strided_slice %28 {offsets = [0, 2, 0], sizes = [16, 14, 8], strides = [1, 1, 1]} : vector<16x16x8xbf16> to vector<16x14x8xbf16>
    %32 = tpu.concatenate %31, %15 in 1 : vector<16x14x8xbf16>, vector<16x2x8xbf16> -> vector<16x16x8xbf16>
    %33 = tpu.concatenate %30, %28, %32 in 2 : vector<16x16x8xbf16>, vector<16x16x8xbf16>, vector<16x16x8xbf16> -> vector<16x16x24xbf16>
    %34 = tpu.concatenate %14, %33, %14 in 0 : vector<2x16x24xbf16>, vector<16x16x24xbf16>, vector<2x16x24xbf16> -> vector<20x16x24xbf16>
    %c1 = arith.constant 1 : index
    %c0_13 = arith.constant 0 : index
    %c0_14 = arith.constant 0 : index
    %c0_15 = arith.constant 0 : index
    %35 = vector.load %arg8[%c1, %c0_13, %c0_14, %c0_15] : memref<2x20x16x24xbf16, #tpu.memory_space<vmem>>, vector<1x20x16x24xbf16>
    %36 = vector.shape_cast %35 : vector<1x20x16x24xbf16> to vector<20x16x24xbf16>
    %37 = vector.shape_cast %34 : vector<20x16x24xbf16> to vector<1x20x16x24xbf16>
    tpu.vector_store %arg8[%c1, %c0_13, %c0_14, %c0_15], %37 {strides = array<i32>} : memref<2x20x16x24xbf16, #tpu.memory_space<vmem>>, vector<1x20x16x24xbf16>,
    %c0_16 = arith.constant 0 : index
    %c0_17 = arith.constant 0 : index
    %c0_18 = arith.constant 0 : index
    %38 = vector.load %arg4[%c0_16, %c0_17, %c0_18] : memref<3x24x8xbf16, #tpu.memory_space<vmem>>, vector<1x24x8xbf16>
    %39 = vector.shape_cast %38 : vector<1x24x8xbf16> to vector<24x8xbf16>
    %c1_19 = arith.constant 1 : index
    %c0_20 = arith.constant 0 : index
    %c0_21 = arith.constant 0 : index
    %40 = vector.load %arg4[%c1_19, %c0_20, %c0_21] : memref<3x24x8xbf16, #tpu.memory_space<vmem>>, vector<1x24x8xbf16>
    %41 = vector.shape_cast %40 : vector<1x24x8xbf16> to vector<24x8xbf16>
    %c2 = arith.constant 2 : index
    %c0_22 = arith.constant 0 : index
    %c0_23 = arith.constant 0 : index
    %42 = vector.load %arg4[%c2, %c0_22, %c0_23] : memref<3x24x8xbf16, #tpu.memory_space<vmem>>, vector<1x24x8xbf16>
    %43 = vector.shape_cast %42 : vector<1x24x8xbf16> to vector<24x8xbf16>
    %c0_24 = arith.constant 0 : index
    %c0_25 = arith.constant 0 : index
    %c0_26 = arith.constant 0 : index
    %c0_27 = arith.constant 0 : index
    %44 = vector.load %arg8[%c0_24, %c0_25, %c0_26, %c0_27] : memref<2x20x16x24xbf16, #tpu.memory_space<vmem>>, vector<1x16x16x24xbf16>
    %45 = vector.shape_cast %44 : vector<1x16x16x24xbf16> to vector<16x16x24xbf16>
    %46 = vector.shape_cast %45 : vector<16x16x24xbf16> to vector<256x24xbf16>
    %cst_28 = arith.constant dense<0.000000e+00> : vector<256x8xf32>
    %47 = tpu.matmul %46, %39, %cst_28 {dimension_numbers = #tpu.dot_dimension_numbers<[1], [0], [0], [1], [0, 0, 1, 1], [], []>} : vector<256x24xbf16>, vector<24x8xbf16>, vector<256x8xf32> -> vector<256x8xf32>
    %c0_29 = arith.constant 0 : index
    %c2_30 = arith.constant 2 : index
    %c0_31 = arith.constant 0 : index
    %c0_32 = arith.constant 0 : index
    %48 = vector.load %arg8[%c0_29, %c2_30, %c0_31, %c0_32] : memref<2x20x16x24xbf16, #tpu.memory_space<vmem>>, vector<1x16x16x24xbf16>
    %49 = vector.shape_cast %48 : vector<1x16x16x24xbf16> to vector<16x16x24xbf16>
    %50 = vector.shape_cast %49 : vector<16x16x24xbf16> to vector<256x24xbf16>
    %cst_33 = arith.constant dense<0.000000e+00> : vector<256x8xf32>
    %51 = tpu.matmul %50, %41, %cst_33 {dimension_numbers = #tpu.dot_dimension_numbers<[1], [0], [0], [1], [0, 0, 1, 1], [], []>} : vector<256x24xbf16>, vector<24x8xbf16>, vector<256x8xf32> -> vector<256x8xf32>
    %52 = arith.addf %47, %51 : vector<256x8xf32>
    %c0_34 = arith.constant 0 : index
    %c4 = arith.constant 4 : index
    %c0_35 = arith.constant 0 : index
    %c0_36 = arith.constant 0 : index
    %53 = vector.load %arg8[%c0_34, %c4, %c0_35, %c0_36] : memref<2x20x16x24xbf16, #tpu.memory_space<vmem>>, vector<1x16x16x24xbf16>
    %54 = vector.shape_cast %53 : vector<1x16x16x24xbf16> to vector<16x16x24xbf16>
    %55 = vector.shape_cast %54 : vector<16x16x24xbf16> to vector<256x24xbf16>
    %cst_37 = arith.constant dense<0.000000e+00> : vector<256x8xf32>
    %56 = tpu.matmul %55, %43, %cst_37 {dimension_numbers = #tpu.dot_dimension_numbers<[1], [0], [0], [1], [0, 0, 1, 1], [], []>} : vector<256x24xbf16>, vector<24x8xbf16>, vector<256x8xf32> -> vector<256x8xf32>
    %57 = arith.addf %52, %56 : vector<256x8xf32>
    %c1_38 = arith.constant 1 : index
    %c0_39 = arith.constant 0 : index
    %c0_40 = arith.constant 0 : index
    %c0_41 = arith.constant 0 : index
    %58 = vector.load %arg8[%c1_38, %c0_39, %c0_40, %c0_41] : memref<2x20x16x24xbf16, #tpu.memory_space<vmem>>, vector<1x16x16x24xbf16>
    %59 = vector.shape_cast %58 : vector<1x16x16x24xbf16> to vector<16x16x24xbf16>
    %60 = vector.shape_cast %59 : vector<16x16x24xbf16> to vector<256x24xbf16>
    %cst_42 = arith.constant dense<0.000000e+00> : vector<256x8xf32>
    %61 = tpu.matmul %60, %39, %cst_42 {dimension_numbers = #tpu.dot_dimension_numbers<[1], [0], [0], [1], [0, 0, 1, 1], [], []>} : vector<256x24xbf16>, vector<24x8xbf16>, vector<256x8xf32> -> vector<256x8xf32>
    %c1_43 = arith.constant 1 : index
    %c2_44 = arith.constant 2 : index
    %c0_45 = arith.constant 0 : index
    %c0_46 = arith.constant 0 : index
    %62 = vector.load %arg8[%c1_43, %c2_44, %c0_45, %c0_46] : memref<2x20x16x24xbf16, #tpu.memory_space<vmem>>, vector<1x16x16x24xbf16>
    %63 = vector.shape_cast %62 : vector<1x16x16x24xbf16> to vector<16x16x24xbf16>
    %64 = vector.shape_cast %63 : vector<16x16x24xbf16> to vector<256x24xbf16>
    %cst_47 = arith.constant dense<0.000000e+00> : vector<256x8xf32>
    %65 = tpu.matmul %64, %41, %cst_47 {dimension_numbers = #tpu.dot_dimension_numbers<[1], [0], [0], [1], [0, 0, 1, 1], [], []>} : vector<256x24xbf16>, vector<24x8xbf16>, vector<256x8xf32> -> vector<256x8xf32>
    %66 = arith.addf %61, %65 : vector<256x8xf32>
    %c1_48 = arith.constant 1 : index
    %c4_49 = arith.constant 4 : index
    %c0_50 = arith.constant 0 : index
    %c0_51 = arith.constant 0 : index
    %67 = vector.load %arg8[%c1_48, %c4_49, %c0_50, %c0_51] : memref<2x20x16x24xbf16, #tpu.memory_space<vmem>>, vector<1x16x16x24xbf16>
    %68 = vector.shape_cast %67 : vector<1x16x16x24xbf16> to vector<16x16x24xbf16>
    %69 = vector.shape_cast %68 : vector<16x16x24xbf16> to vector<256x24xbf16>
    %cst_52 = arith.constant dense<0.000000e+00> : vector<256x8xf32>
    %70 = tpu.matmul %69, %43, %cst_52 {dimension_numbers = #tpu.dot_dimension_numbers<[1], [0], [0], [1], [0, 0, 1, 1], [], []>} : vector<256x24xbf16>, vector<24x8xbf16>, vector<256x8xf32> -> vector<256x8xf32>
    %71 = arith.addf %66, %70 : vector<256x8xf32>
    %72 = tpu.concatenate %57, %71 in 0 : vector<256x8xf32>, vector<256x8xf32> -> vector<512x8xf32>
    %c0_53 = arith.constant 0 : index
    %c0_54 = arith.constant 0 : index
    %73 = vector.load %arg5[%c0_53, %c0_54] : memref<2x8xf32, #tpu.memory_space<vmem>>, vector<1x8xf32>
    %74 = vector.broadcast %73 : vector<1x8xf32> to vector<512x8xf32>
    %75 = arith.addf %72, %74 : vector<512x8xf32>
    %cst_55 = arith.constant 0.000000e+00 : f32
    %76 = vector.broadcast %cst_55 : f32 to vector<512x8xf32>
    %77 = arith.maximumf %75, %76 : vector<512x8xf32>
    %78 = arith.truncf %77 : vector<512x8xf32> to vector<512x8xbf16>
    %c0_56 = arith.constant 0 : index
    %c0_57 = arith.constant 0 : index
    %79 = vector.load %arg6[%c0_56, %c0_57] : memref<8x8xbf16, #tpu.memory_space<vmem>>, vector<8x8xbf16>
    %cst_58 = arith.constant dense<0.000000e+00> : vector<512x8xf32>
    %80 = tpu.matmul %78, %79, %cst_58 {dimension_numbers = #tpu.dot_dimension_numbers<[1], [0], [0], [1], [0, 0, 1, 1], [], []>} : vector<512x8xbf16>, vector<8x8xbf16>, vector<512x8xf32> -> vector<512x8xf32>
    %c1_59 = arith.constant 1 : index
    %c0_60 = arith.constant 0 : index
    %81 = vector.load %arg5[%c1_59, %c0_60] : memref<2x8xf32, #tpu.memory_space<vmem>>, vector<1x8xf32>
    %82 = vector.broadcast %81 : vector<1x8xf32> to vector<512x8xf32>
    %83 = arith.addf %80, %82 : vector<512x8xf32>
    %84 = arith.extf %11 : vector<512x8xbf16> to vector<512x8xf32>
    %85 = arith.addf %83, %84 : vector<512x8xf32>
    %cst_61 = arith.constant 0.000000e+00 : f32
    %86 = vector.broadcast %cst_61 : f32 to vector<512x8xf32>
    %87 = arith.maximumf %85, %86 : vector<512x8xf32>
    %88 = vector.shape_cast %87 : vector<512x8xf32> to vector<2x256x8xf32>
    %c0_62 = arith.constant 0 : index
    %c0_63 = arith.constant 0 : index
    %c0_64 = arith.constant 0 : index
    %89 = vector.load %arg7[%c0_62, %c0_63, %c0_64] : memref<2x256x8xf32, #tpu.memory_space<vmem>>, vector<2x256x8xf32>
    tpu.vector_store %arg7[%c0_62, %c0_63, %c0_64], %88 {strides = array<i32>} : memref<2x256x8xf32, #tpu.memory_space<vmem>>, vector<2x256x8xf32>,
    return
  }
  func.func @transform_0(%arg0: i32) -> (i32, i32, i32) {
    %c0_i32 = arith.constant 0 : i32
    %c0_i32_0 = arith.constant 0 : i32
    %c0_i32_1 = arith.constant 0 : i32
    return %arg0, %c0_i32, %c0_i32_0 : i32, i32, i32
  }
  func.func @transform_1(%arg0: i32) -> (i32, i32) {
    %c0_i32 = arith.constant 0 : i32
    %c0_i32_0 = arith.constant 0 : i32
    %c0_i32_1 = arith.constant 0 : i32
    return %c0_i32, %c0_i32_0 : i32, i32
  }
  func.func @transform_2(%arg0: i32) -> (i32, i32) {
    %c0_i32 = arith.constant 0 : i32
    %c0_i32_0 = arith.constant 0 : i32
    %c0_i32_1 = arith.constant 0 : i32
    return %c0_i32, %c0_i32_0 : i32, i32
  }
  func.func @transform_3(%arg0: i32) -> (i32, i32, i32) {
    %c0_i32 = arith.constant 0 : i32
    %c0_i32_0 = arith.constant 0 : i32
    %c0_i32_1 = arith.constant 0 : i32
    %c0_i32_2 = arith.constant 0 : i32
    return %c0_i32, %c0_i32_0, %c0_i32_1 : i32, i32, i32
  }
  func.func @transform_4(%arg0: i32) -> (i32, i32) {
    %c0_i32 = arith.constant 0 : i32
    %c0_i32_0 = arith.constant 0 : i32
    %c0_i32_1 = arith.constant 0 : i32
    return %c0_i32, %c0_i32_0 : i32, i32
  }
  func.func @transform_5(%arg0: i32) -> (i32, i32) {
    %c0_i32 = arith.constant 0 : i32
    %c0_i32_0 = arith.constant 0 : i32
    %c0_i32_1 = arith.constant 0 : i32
    return %c0_i32, %c0_i32_0 : i32, i32
  }
  func.func @transform_6(%arg0: i32) -> (i32, i32, i32) {
    %c0_i32 = arith.constant 0 : i32
    %c0_i32_0 = arith.constant 0 : i32
    %c0_i32_1 = arith.constant 0 : i32
    return %arg0, %c0_i32, %c0_i32_0 : i32, i32, i32
  }
}

</mosaic_0001>

<bundles_post_ra>
// kernel: tpu_custom_call.1
= control target key start
LH: loop header
LB: loop body
LE: loop exit
PB: predicated region body
PF: predicated region fallthrough
CT: control target
= control target key end

     0   :  { %vm353_vm0 = vcmask 1041408   ;;  %vm256_vm1 = vcmask 31744   ;;  %vm1466_vm2 = vcmask 1043456   ;;  %vm856_vm3 = vcmask 1046528   ;;  %s5038_s16 = smov 8   ;;  %s5039_s17 = smov 16   ;;  %s6687_s1 = inlined_call_operand.vmem [shape: bf16[4,16], index: 1, kind: input, shape index: {}]   ;;  %s6688_s0 = inlined_call_operand.vmem [shape: bf16[2,256,4], index: 0, kind: input, shape index: {}]   ;;  %s6689_s3 = inlined_call_operand.vmem [shape: bf16[3,24,8], index: 3, kind: input, shape index: {}]   ;;  %s6690_s2 = inlined_call_operand.vmem [shape: f32[1,16], index: 2, kind: input, shape index: {}]   ;;  %s6691_s5 = inlined_call_operand.vmem [shape: bf16[8,8], index: 5, kind: input, shape index: {}]   ;;  %s6692_s4 = inlined_call_operand.vmem [shape: f32[2,8], index: 4, kind: input, shape index: {}]   ;;  %s6693_s6 = inlined_call_operand.vmem [shape: f32[2,256,8], index: 6, kind: output, shape index: {}]  }
   0x1   :  { %v88_v0 = vld [vmem:[%s6687_s1] sm:$0x3]  ;;  %v4936_v3 = vld [vmem:[%s6688_s0 + $0x8] sm:$0xff]   ;;  %v4937_v4 = vld [vmem:[%s6688_s0 + $0x10] sm:$0xff]   ;;  %vm1051_vm4 = vcmask 195584   ;;  %vm806_vm5 = vcmask 1040384  }
   0x2   :  { %4763 = vmatprep.subr.msk.bf16.mxu0 %vm353_vm0, %v88_v0  ;;  %v355_v1 = vsel %vm353_vm0, %v88_v0, 0  ;;  %v4935_v2 = vld [vmem:[%s6688_s0] sm:$0xff]   ;;  %v4938_v5 = vld [vmem:[%s6688_s0 + $0x18] sm:$0xff]   ;;  %v4940_v7 = vld [vmem:[%s6688_s0 + $0x28] sm:$0xff]   ;;  %vm969_vm6 = vcmask 64512   ;;  %vm1002_vm7 = vcmask 130048  }
   0x3   :  { %4288 = vmatpush3.bf16.msra.mxu0 %v355_v1  ;;  %4289 = vmatprep.mubr.msk.bf16.mxu0 %vm256_vm1, %v4935_v2  ;;  %v4939_v6 = vld [vmem:[%s6688_s0 + $0x20] sm:$0xff]   ;;  %v4941_v8 = vld [vmem:[%s6688_s0 + $0x30] sm:$0xff]   ;;  %v4942_v9 = vld [vmem:[%s6688_s0 + $0x38] sm:$0xff]   ;;  %s5041_s20 = smov 120  }
   0x4   :  { %v4943_v10 = vld [vmem:[%s6688_s0 + $0x40] sm:$0xff]   ;;  %v4944_v11 = vld [vmem:[%s6688_s0 + $0x48] sm:$0xff]   ;;  %v4945_v12 = vld [vmem:[%s6688_s0 + $0x50] sm:$0xff]  }
   0x5   :  { %v4946_v13 = vld [vmem:[%s6688_s0 + $0x58] sm:$0xff]   ;;  %v4947_v14 = vld [vmem:[%s6688_s0 + $0x60] sm:$0xff]   ;;  %v4948_v15 = vld [vmem:[%s6688_s0 + $0x68] sm:$0xff]  }
   0x6   :  { %4290 = vmatmul.mubr.msk.bf16.vlgmr.msra.gmra.mrb[0].mxu0 %vm256_vm1, %v4936_v3  ;;  %v4949_v16 = vld [vmem:[%s6688_s0 + $0x70] sm:$0xff]   ;;  %v4950_v17 = vld [vmem:[%s6688_s0 + $0x78] sm:$0xff]   ;;  %v4951_v18 = vld [vmem:[%s6688_s0 + $0x80] sm:$0xff]  }
   0x7   :  { %4293 = vmatprep.mubr.msk.bf16.mxu0 %vm256_vm1, %v4937_v4  ;;  %v4952_v19 = vld [vmem:[%s6688_s0 + $0x88] sm:$0xff]   ;;  %v4953_v20 = vld [vmem:[%s6688_s0 + $0x90] sm:$0xff]   ;;  %v4954_v21 = vld [vmem:[%s6688_s0 + $0x98] sm:$0xff]  }
   0x8   :  { %v4955_v22 = vld [vmem:[%s6688_s0 + $0xa0] sm:$0xff]   ;;  %v4956_v23 = vld [vmem:[%s6688_s0 + $0xa8] sm:$0xff]   ;;  %v4957_v24 = vld [vmem:[%s6688_s0 + $0xb0] sm:$0xff]  }
   0x9   :  { %v4958_v25 = vld [vmem:[%s6688_s0 + $0xb8] sm:$0xff]   ;;  %v4959_v26 = vld [vmem:[%s6688_s0 + $0xc0] sm:$0xff]   ;;  %v4960_v27 = vld [vmem:[%s6688_s0 + $0xc8] sm:$0xff]  }
   0xa   :  { %v4961_v28 = vld [vmem:[%s6688_s0 + $0xd0] sm:$0xff]   ;;  %v4962_v29 = vld [vmem:[%s6688_s0 + $0xd8] sm:$0xff]   ;;  %v4963_v30 = vld [vmem:[%s6688_s0 + $0xe0] sm:$0xff]  }
   0xb   :  { %v4964_v31 = vld [vmem:[%s6688_s0 + $0xe8] sm:$0xff]   ;;  %v4965_v32 = vld [vmem:[%s6688_s0 + $0xf0] sm:$0xff]   ;;  %v4966_v33 = vld [vmem:[%s6688_s0 + $0xf8] sm:$0xff]  }
   0xc   :  { %v4967_v34 = vld [vmem:[%s6689_s3 + $0xc] sm:$0xff]   ;;  %v5214_v35 = vld [vmem:[%s6690_s2] ss:$0 sm:$0xff]  ;;  %v4968_v49 = vld [vmem:[%s6689_s3 + $0x14] ss:$0 sps:$4 sm:$0xff]  }
   0xd   :  { %4461 = vmatprep.subr.bf16.mxu0 %v4967_v34  ;;  %4353 = vmatprep.subr.bf16.mxu1 %v4967_v34  ;;  %v1468_v54 = vsel %vm1466_vm2, %v4968_v49, 0  ;;  %v5266_v2 = vld [vmem:[%s6689_s3] sm:$0xff]  }
   0xe   :  { %4294 = vmatmul.mubr.msk.bf16.gmra.mrb[4].mxu0 %vm256_vm1, %v4938_v5  ;;  %4354 = vmatpush3.bf16.msra.mxu1 %v4967_v34 }
   0xf   :  { %4297 = vmatprep.mubr.msk.bf16.mxu0 %vm256_vm1, %v4939_v6  ;;  %4462 = vmatpush3.bf16.msra.mxu0 %v4967_v34 }
  0x10   :  { %4764 = vmatprep.subr.msk.bf16.mxu1 %vm1466_vm2, %v4968_v49  ;;  %4767 = vmatprep.subr.msk.bf16.mxu0 %vm1466_vm2, %v4968_v49 }
  0x12   :  { %4356 = vmatpush3.bf16.msra.mxu1 %v1468_v54 }
  0x13   :  { %4464 = vmatpush3.bf16.msra.mxu0 %v1468_v54  ;;  %4389 = vmatprep.subr.bf16.mxu1 %v5266_v2 }
  0x14   :  { %4497 = vmatprep.subr.bf16.mxu0 %v5266_v2 }
  0x16   :  { %4298 = vmatmul.mubr.msk.bf16.gmra.mrb[8].mxu0 %vm256_vm1, %v4940_v7 }
  0x17   :  { %4301 = vmatprep.mubr.msk.bf16.mxu0 %vm256_vm1, %v4941_v8 }
  0x1e   :  { %4302 = vmatmul.mubr.msk.bf16.gmra.mrb[12].mxu0 %vm256_vm1, %v4942_v9 }
  0x1f   :  { %4305 = vmatprep.mubr.msk.bf16.mxu0 %vm256_vm1, %v4943_v10 }
  0x26   :  { %4306 = vmatmul.mubr.msk.bf16.gmra.mrb[16].mxu0 %vm256_vm1, %v4944_v11 }
  0x27   :  { %4309 = vmatprep.mubr.msk.bf16.mxu0 %vm256_vm1, %v4945_v12 }
  0x2e   :  { %4310 = vmatmul.mubr.msk.bf16.gmra.mrb[20].mxu0 %vm256_vm1, %v4946_v13 }
  0x2f   :  { %4313 = vmatprep.mubr.msk.bf16.mxu0 %vm256_vm1, %v4947_v14 }
  0x36   :  { %4314 = vmatmul.mubr.msk.bf16.gmra.mrb[24].mxu0 %vm256_vm1, %v4948_v15 }
  0x37   :  { %4317 = vmatprep.mubr.msk.bf16.mxu0 %vm256_vm1, %v4949_v16 }
  0x3e   :  { %4318 = vmatmul.mubr.msk.bf16.gmra.mrb[28].mxu0 %vm256_vm1, %v4950_v17 }
  0x3f   :  { %4321 = vmatprep.mubr.msk.bf16.mxu0 %vm256_vm1, %v4951_v18 }
  0x46   :  { %4322 = vmatmul.mubr.msk.bf16.gmra.mrb[32].mxu0 %vm256_vm1, %v4952_v19 }
  0x47   :  { %4325 = vmatprep.mubr.msk.bf16.mxu0 %vm256_vm1, %v4953_v20 }
  0x4e   :  { %4326 = vmatmul.mubr.msk.bf16.gmra.mrb[36].mxu0 %vm256_vm1, %v4954_v21 }
  0x4f   :  { %4329 = vmatprep.mubr.msk.bf16.mxu0 %vm256_vm1, %v4955_v22 }
  0x56   :  { %4330 = vmatmul.mubr.msk.bf16.gmra.mrb[40].mxu0 %vm256_vm1, %v4956_v23 }
  0x57   :  { %4333 = vmatprep.mubr.msk.bf16.mxu0 %vm256_vm1, %v4957_v24 }
  0x5e   :  { %4334 = vmatmul.mubr.msk.bf16.gmra.mrb[44].mxu0 %vm256_vm1, %v4958_v25 }
  0x5f   :  { %4337 = vmatprep.mubr.msk.bf16.mxu0 %vm256_vm1, %v4959_v26 }
  0x66   :  { %4338 = vmatmul.mubr.msk.bf16.gmra.mrb[48].mxu0 %vm256_vm1, %v4960_v27 }
  0x67   :  { %4341 = vmatprep.mubr.msk.bf16.mxu0 %vm256_vm1, %v4961_v28 }
  0x6e   :  { %4342 = vmatmul.mubr.msk.bf16.gmra.mrb[52].mxu0 %vm256_vm1, %v4962_v29 }
  0x6f   :  { %4345 = vmatprep.mubr.msk.bf16.mxu0 %vm256_vm1, %v4963_v30 }
  0x76   :  { %4346 = vmatmul.mubr.msk.bf16.gmra.mrb[56].mxu0 %vm256_vm1, %v4964_v31 }
  0x77   :  { %4349 = vmatprep.mubr.msk.bf16.mxu0 %vm256_vm1, %v4965_v32 }
  0x7e   :  { %4350 = vmatmul.mubr.msk.bf16.gmra.mrb[60].mxu0 %vm256_vm1, %v4966_v33 }
  0xd9   :  { %v4291_v36 = vpop.f32.mrb[0].mxu0 }
  0xda   :  { %v5217_v37 = vadd.f32 %v4291_v36, %v5214_v35  ;;  %v391_v38 = vpop.f32.mrb[1].mxu0 }
  0xdb   :  { %v5220_v39 = vadd.f32 %v5214_v35, %v391_v38  ;;  %v4292_v40 = vpop.f32.mrb[2].mxu0 }
  0xdc   :  { %v5223_v41 = vadd.f32 %v4292_v40, %v5214_v35  ;;  %v394_v42 = vpop.f32.mrb[3].mxu0  ;;  %v648_v44 = vmax.f32 %v5217_v37, 0.0 }
  0xdd   :  { %v5226_v43 = vadd.f32 %v5214_v35, %v394_v42  ;;  %v646_v46 = vmax.f32 %v5220_v39, 0.0 }
  0xde   :  { %v649_v45 = vmax.f32 %v5223_v41, 0.0 }
  0xdf   :  { %v647_v47 = vmax.f32 %v5226_v43, 0.0 }
  0xe0   :  { %v5232_v48 = vpack.c.bf16 %v649_v45, %v648_v44 }
  0xe1   :  { %v4295_v50 = vpop.f32.mrb[4].mxu0  ;;  %v5237_v51 = vpack.c.bf16 %v647_v47, %v646_v46 }
  0xe2   :  { %v5240_v52 = vadd.f32 %v4295_v50, %v5214_v35  ;;  %v407_v53 = vpop.f32.mrb[5].mxu0  ;;  %v841_v0 = vrot.slane %v5232_v48, 1 }
  0xe3   :  { %v5246_v55 = vadd.f32 %v5214_v35, %v407_v53  ;;  %v4296_v56 = vpop.f32.mrb[6].mxu0  ;;  %889 = vrot.lane.b32.xlu0 %v5237_v51, %s5038_s16  ;;  %v840_v57 = vrot.slane %v5237_v51, 1 }
  0xe4   :  { %v652_v58 = vmax.f32 %v5240_v52, 0.0  ;;  %v5253_v59 = vadd.f32 %v4296_v56, %v5214_v35  ;;  %v410_v60 = vpop.f32.mrb[7].mxu0  ;;  %v860_v6 = vsel %vm856_vm3, %v841_v0, 0 }
  0xe5   :  { %v650_v61 = vmax.f32 %v5246_v55, 0.0  ;;  %v5257_v62 = vadd.f32 %v5214_v35, %v410_v60  ;;  %v858_v63 = vsel %vm856_vm3, %v840_v57, 0 }
  0xe6   :  { %v653_v1 = vmax.f32 %v5253_v59, 0.0  ;;  %937 = vrot.lane.b32.xlu1 %v858_v63, %s5039_s17 }
  0xe7   :  { %v651_v3 = vmax.f32 %v5257_v62, 0.0  ;;  %891 = vrot.lane.b32.xlu0 %v5232_v48, %s5038_s16 }
  0xe8   :  { %v5271_v4 = vpack.c.bf16 %v653_v1, %v652_v58 }
  0xe9   :  { %v4299_v5 = vpop.f32.mrb[8].mxu0  ;;  %v5276_v7 = vpack.c.bf16 %v651_v3, %v650_v61 }
  0xea   :  { %v5279_v8 = vadd.f32 %v4299_v5, %v5214_v35  ;;  %v423_v9 = vpop.f32.mrb[9].mxu0  ;;  %939 = vrot.lane.b32.xlu1 %v860_v6, %s5039_s17  ;;  %v843_v19 = vrot.slane %v5271_v4, 1 }
  0xeb   :  { %v5283_v10 = vadd.f32 %v5214_v35, %v423_v9  ;;  %v4300_v11 = vpop.f32.mrb[10].mxu0  ;;  %893 = vrot.lane.b32.xlu0 %v5276_v7, %s5038_s16  ;;  %v842_v12 = vrot.slane %v5276_v7, 1 }
  0xec   :  { %v656_v13 = vmax.f32 %v5279_v8, 0.0  ;;  %v5290_v14 = vadd.f32 %v4300_v11, %v5214_v35  ;;  %v426_v15 = vpop.f32.mrb[11].mxu0  ;;  %v864_v24 = vsel %vm856_vm3, %v843_v19, 0 }
  0xed   :  { %v654_v16 = vmax.f32 %v5283_v10, 0.0  ;;  %v5294_v17 = vadd.f32 %v5214_v35, %v426_v15  ;;  %v862_v18 = vsel %vm856_vm3, %v842_v12, 0 }
  0xee   :  { %v657_v20 = vmax.f32 %v5290_v14, 0.0  ;;  %895 = vrot.lane.b32.xlu1 %v5271_v4, %s5038_s16 }
  0xef   :  { %v655_v21 = vmax.f32 %v5294_v17, 0.0  ;;  %941 = vrot.lane.b32.xlu0 %v862_v18, %s5039_s17 }
  0xf0   :  { %v5303_v22 = vpack.c.bf16 %v657_v20, %v656_v13 }
  0xf1   :  { %v4303_v23 = vpop.f32.mrb[12].mxu0  ;;  %v5306_v25 = vpack.c.bf16 %v655_v21, %v654_v16 }
  0xf2   :  { %v5309_v26 = vadd.f32 %v4303_v23, %v5214_v35  ;;  %v439_v27 = vpop.f32.mrb[13].mxu0  ;;  %943 = vrot.lane.b32.xlu1 %v864_v24, %s5039_s17  ;;  %v845_v40 = vrot.slane %v5303_v22, 1 }
  0xf3   :  { %v5313_v28 = vadd.f32 %v5214_v35, %v439_v27  ;;  %v4304_v29 = vpop.f32.mrb[14].mxu0  ;;  %897 = vrot.lane.b32.xlu0 %v5306_v25, %s5038_s16  ;;  %v844_v30 = vrot.slane %v5306_v25, 1 }
  0xf4   :  { %v660_v31 = vmax.f32 %v5309_v26, 0.0  ;;  %v5320_v32 = vadd.f32 %v4304_v29, %v5214_v35  ;;  %v442_v33 = vpop.f32.mrb[15].mxu0  ;;  %v868_v47 = vsel %vm856_vm3, %v845_v40, 0 }
  0xf5   :  { %v658_v34 = vmax.f32 %v5313_v28, 0.0  ;;  %v5324_v36 = vadd.f32 %v5214_v35, %v442_v33  ;;  %v866_v38 = vsel %vm856_vm3, %v844_v30, 0 }
  0xf6   :  { %v661_v42 = vmax.f32 %v5320_v32, 0.0  ;;  %899 = vrot.lane.b32.xlu1 %v5303_v22, %s5038_s16 }
  0xf7   :  { %v659_v44 = vmax.f32 %v5324_v36, 0.0  ;;  %945 = vrot.lane.b32.xlu0 %v866_v38, %s5039_s17 }
  0xf8   :  { %v5333_v45 = vpack.c.bf16 %v661_v42, %v660_v31 }
  0xf9   :  { %v4307_v46 = vpop.f32.mrb[16].mxu0  ;;  %v5336_v49 = vpack.c.bf16 %v659_v44, %v658_v34 }
  0xfa   :  { %v5339_v50 = vadd.f32 %v4307_v46, %v5214_v35  ;;  %v455_v53 = vpop.f32.mrb[17].mxu0  ;;  %947 = vrot.lane.b32.xlu1 %v868_v47, %s5039_s17  ;;  %v847_v3 = vrot.slane %v5333_v45, 1 }
  0xfb   :  { %v5343_v54 = vadd.f32 %v5214_v35, %v455_v53  ;;  %v4308_v56 = vpop.f32.mrb[18].mxu0  ;;  %901 = vrot.lane.b32.xlu0 %v5336_v49, %s5038_s16  ;;  %v846_v57 = vrot.slane %v5336_v49, 1 }
  0xfc   :  { %v664_v58 = vmax.f32 %v5339_v50, 0.0  ;;  %v5350_v60 = vadd.f32 %v4308_v56, %v5214_v35  ;;  %v458_v61 = vpop.f32.mrb[19].mxu0  ;;  %v872_v12 = vsel %vm856_vm3, %v847_v3, 0 }
  0xfd   :  { %v662_v63 = vmax.f32 %v5343_v54, 0.0  ;;  %v5354_v0 = vadd.f32 %v5214_v35, %v458_v61  ;;  %v870_v1 = vsel %vm856_vm3, %v846_v57, 0 }
  0xfe   :  { %v665_v5 = vmax.f32 %v5350_v60, 0.0  ;;  %903 = vrot.lane.b32.xlu1 %v5333_v45, %s5038_s16 }
  0xff   :  { %v663_v6 = vmax.f32 %v5354_v0, 0.0  ;;  %949 = vrot.lane.b32.xlu0 %v870_v1, %s5039_s17 }
 0x100   :  { %v5363_v9 = vpack.c.bf16 %v665_v5, %v664_v58 }
 0x101   :  { %v4311_v11 = vpop.f32.mrb[20].mxu0  ;;  %v5366_v13 = vpack.c.bf16 %v663_v6, %v662_v63 }
 0x102   :  { %v5369_v15 = vadd.f32 %v4311_v11, %v5214_v35  ;;  %v471_v16 = vpop.f32.mrb[21].mxu0  ;;  %951 = vrot.lane.b32.xlu1 %v872_v12, %s5039_s17  ;;  %v849_v31 = vrot.slane %v5363_v9, 1 }
 0x103   :  { %v5373_v18 = vadd.f32 %v5214_v35, %v471_v16  ;;  %v4312_v19 = vpop.f32.mrb[22].mxu0  ;;  %905 = vrot.lane.b32.xlu0 %v5366_v13, %s5038_s16  ;;  %v848_v20 = vrot.slane %v5366_v13, 1 }
 0x104   :  { %v668_v21 = vmax.f32 %v5369_v15, 0.0  ;;  %v5380_v23 = vadd.f32 %v4312_v19, %v5214_v35  ;;  %v474_v24 = vpop.f32.mrb[23].mxu0  ;;  %v876_v42 = vsel %vm856_vm3, %v849_v31, 0 }
 0x105   :  { %v666_v27 = vmax.f32 %v5373_v18, 0.0  ;;  %v5384_v29 = vadd.f32 %v5214_v35, %v474_v24  ;;  %v874_v30 = vsel %vm856_vm3, %v848_v20, 0 }
 0x106   :  { %v669_v33 = vmax.f32 %v5380_v23, 0.0  ;;  %907 = vrot.lane.b32.xlu1 %v5363_v9, %s5038_s16 }
 0x107   :  { %v667_v34 = vmax.f32 %v5384_v29, 0.0  ;;  %953 = vrot.lane.b32.xlu0 %v874_v30, %s5039_s17 }
 0x108   :  { %v5393_v38 = vpack.c.bf16 %v669_v33, %v668_v21 }
 0x109   :  { %v4315_v40 = vpop.f32.mrb[24].mxu0  ;;  %v5396_v44 = vpack.c.bf16 %v667_v34, %v666_v27 }
 0x10a   :  { %v5399_v46 = vadd.f32 %v4315_v40, %v5214_v35  ;;  %v487_v47 = vpop.f32.mrb[25].mxu0  ;;  %955 = vrot.lane.b32.xlu1 %v876_v42, %s5039_s17  ;;  %v851_v6 = vrot.slane %v5393_v38, 1 }
 0x10b   :  { %v5403_v53 = vadd.f32 %v5214_v35, %v487_v47  ;;  %v4316_v56 = vpop.f32.mrb[26].mxu0  ;;  %909 = vrot.lane.b32.xlu0 %v5396_v44, %s5038_s16  ;;  %v850_v57 = vrot.slane %v5396_v44, 1 }
 0x10c   :  { %v672_v58 = vmax.f32 %v5399_v46, 0.0  ;;  %v5410_v61 = vadd.f32 %v4316_v56, %v5214_v35  ;;  %v490_v63 = vpop.f32.mrb[27].mxu0  ;;  %v880_v20 = vsel %vm856_vm3, %v851_v6, 0 }
 0x10d   :  { %v670_v1 = vmax.f32 %v5403_v53, 0.0  ;;  %v5414_v3 = vadd.f32 %v5214_v35, %v490_v63  ;;  %v878_v5 = vsel %vm856_vm3, %v850_v57, 0 }
 0x10e   :  { %v673_v11 = vmax.f32 %v5410_v61, 0.0  ;;  %911 = vrot.lane.b32.xlu1 %v5393_v38, %s5038_s16 }
 0x10f   :  { %v671_v12 = vmax.f32 %v5414_v3, 0.0  ;;  %957 = vrot.lane.b32.xlu0 %v878_v5, %s5039_s17 }
 0x110   :  { %v5423_v16 = vpack.c.bf16 %v673_v11, %v672_v58 }
 0x111   :  { %v4319_v19 = vpop.f32.mrb[28].mxu0  ;;  %v5426_v21 = vpack.c.bf16 %v671_v12, %v670_v1 }
 0x112   :  { %6741 = vst [vmem:[#allocation3_spill] sm:$0xff] %v5423_v16  ;;  %v5429_v24 = vadd.f32 %v4319_v19, %v5214_v35  ;;  %v503_v27 = vpop.f32.mrb[29].mxu0  ;;  %959 = vrot.lane.b32.xlu1 %v880_v20, %s5039_s17  ;;  %v853_v58 = vrot.slane %v5423_v16, 1 }
 0x113   :  { %6742 = vst [vmem:[#allocation4_spill] sm:$0xff] %v5426_v21  ;;  %v5433_v30 = vadd.f32 %v5214_v35, %v503_v27  ;;  %v4320_v31 = vpop.f32.mrb[30].mxu0  ;;  %913 = vrot.lane.b32.xlu0 %v5426_v21, %s5038_s16  ;;  %v852_v33 = vrot.slane %v5426_v21, 1 }
 0x114   :  { %v676_v34 = vmax.f32 %v5429_v24, 0.0  ;;  %v5440_v40 = vadd.f32 %v4320_v31, %v5214_v35  ;;  %v506_v42 = vpop.f32.mrb[31].mxu0  ;;  %v884_v11 = vsel %vm856_vm3, %v853_v58, 0 }
 0x115   :  { %v674_v47 = vmax.f32 %v5433_v30, 0.0  ;;  %v5444_v56 = vadd.f32 %v5214_v35, %v506_v42  ;;  %v882_v57 = vsel %vm856_vm3, %v852_v33, 0 }
 0x116   :  { %v677_v63 = vmax.f32 %v5440_v40, 0.0  ;;  %915 = vrot.lane.b32.xlu1 %v5423_v16, %s5038_s16 }
 0x117   :  { %v675_v1 = vmax.f32 %v5444_v56, 0.0  ;;  %961 = vrot.lane.b32.xlu0 %v882_v57, %s5039_s17 }
 0x118   :  { %v5453_v5 = vpack.c.bf16 %v677_v63, %v676_v34 }
 0x119   :  { %v4323_v6 = vpop.f32.mrb[32].mxu0  ;;  %v5456_v12 = vpack.c.bf16 %v675_v1, %v674_v47 }
 0x11a   :  { %6743 = vst [vmem:[#allocation5_spill] sm:$0xff] %v5453_v5  ;;  %v5459_v19 = vadd.f32 %v4323_v6, %v5214_v35  ;;  %v519_v20 = vpop.f32.mrb[33].mxu0  ;;  %963 = vrot.lane.b32.xlu1 %v884_v11, %s5039_s17  ;;  %v855_v1 = vrot.slane %v5453_v5, 1 }
 0x11b   :  { %6744 = vst [vmem:[#allocation6_spill] sm:$0xff] %v5456_v12  ;;  %v5463_v27 = vadd.f32 %v5214_v35, %v519_v20  ;;  %v4324_v31 = vpop.f32.mrb[34].mxu0  ;;  %917 = vrot.lane.b32.xlu0 %v5456_v12, %s5038_s16  ;;  %v854_v33 = vrot.slane %v5456_v12, 1 }
 0x11c   :  { %6745 = vst [vmem:[#allocation7_spill] sm:$0xff] %v5459_v19  ;;  %v680_v34 = vmax.f32 %v5459_v19, 0.0  ;;  %v5470_v42 = vadd.f32 %v4324_v31, %v5214_v35  ;;  %v522_v47 = vpop.f32.mrb[35].mxu0 }
 0x11d   :  { %v678_v57 = vmax.f32 %v5463_v27, 0.0  ;;  %v5474_v58 = vadd.f32 %v5214_v35, %v522_v47  ;;  %v886_v63 = vsel %vm856_vm3, %v854_v33, 0  ;;  %v888_v47 = vsel %vm856_vm3, %v855_v1, 0 }
 0x11e   :  { %6746 = vst [vmem:[#allocation8_spill] sm:$0xff] %v5470_v42  ;;  %v681_v6 = vmax.f32 %v5470_v42, 0.0  ;;  %919 = vrot.lane.b32.xlu1 %v5453_v5, %s5038_s16  ;;  %v5040_v33 = vmov 0  }
 0x11f   :  { %v679_v11 = vmax.f32 %v5474_v58, 0.0  ;;  %965 = vrot.lane.b32.xlu0 %v886_v63, %s5039_s17  ;;  %1052 = vst.msk [vmem:[#allocation2] sm:$0xff] %vm1051_vm4, %v5040_v33  ;;  %1053 = vst.msk [vmem:[#allocation2 + $0x8] sm:$0xff] %vm1051_vm4, %v5040_v33 }
 0x120   :  { %v5483_v20 = vpack.c.bf16 %v681_v6, %v680_v34  ;;  %1070 = vst.msk [vmem:[#allocation2 + $0x90] sm:$0xff] %vm1051_vm4, %v5040_v33  ;;  %1071 = vst.msk [vmem:[#allocation2 + $0x98] sm:$0xff] %vm1051_vm4, %v5040_v33 }
 0x121   :  { %v4327_v31 = vpop.f32.mrb[36].mxu0  ;;  %v5486_v12 = vpack.c.bf16 %v679_v11, %v678_v57  ;;  %1345 = vst.msk [vmem:[#allocation2 + $0xa0] sm:$0xff] %vm1051_vm4, %v5040_v33  ;;  %1346 = vst.msk [vmem:[#allocation2 + $0xa8] sm:$0xff] %vm1051_vm4, %v5040_v33 }
 0x122   :  { %6747 = vst [vmem:[#allocation9_spill] sm:$0xff] %v5483_v20  ;;  %1363 = vst.msk [vmem:[#allocation2 + $0x130] sm:$0xff] %vm1051_vm4, %v5040_v33  ;;  %v5497_v34 = vadd.f32 %v4327_v31, %v5214_v35  ;;  %v535_v57 = vpop.f32.mrb[37].mxu0  ;;  %967 = vrot.lane.b32.xlu1 %v888_v47, %s5039_s17 }
 0x123   :  { %6748 = vst [vmem:[#allocation10_spill] sm:$0xff] %v5486_v12  ;;  %1364 = vst.msk [vmem:[#allocation2 + $0x138] sm:$0xff] %vm1051_vm4, %v5040_v33  ;;  %v5501_v63 = vadd.f32 %v5214_v35, %v535_v57  ;;  %v4328_v1 = vpop.f32.mrb[38].mxu0  ;;  %1184 = vrot.lane.b32.xlu0 %v5486_v12, %s5038_s16  ;;  %v1136_v6 = vrot.slane %v5486_v12, 1  ;;  %v1137_v57 = vrot.slane %v5483_v20, 1 }
 0x124   :  { %6749 = vst [vmem:[#allocation11_spill] sm:$0xff] %v5497_v34  ;;  %v684_v11 = vmax.f32 %v5497_v34, 0.0  ;;  %v5508_v5 = vadd.f32 %v4328_v1, %v5214_v35  ;;  %v538_v33 = vpop.f32.mrb[39].mxu0 }
 0x125   :  { %6750 = vst [vmem:[#allocation12_spill] sm:$0xff] %v5501_v63  ;;  %v682_v31 = vmax.f32 %v5501_v63, 0.0  ;;  %v5512_v16 = vadd.f32 %v5214_v35, %v538_v33  ;;  %v1153_v47 = vsel %vm856_vm3, %v1136_v6, 0  ;;  %v1155_v63 = vsel %vm856_vm3, %v1137_v57, 0 }
 0x126   :  { %6751 = vst [vmem:[#allocation13_spill] sm:$0xff] %v5508_v5  ;;  %v685_v42 = vmax.f32 %v5508_v5, 0.0  ;;  %1186 = vrot.lane.b32.xlu1 %v5483_v20, %s5038_s16 }
 0x127   :  { %6752 = vst [vmem:[#allocation14_spill] sm:$0xff] %v5512_v16  ;;  %v683_v12 = vmax.f32 %v5512_v16, 0.0  ;;  %1232 = vrot.lane.b32.xlu0 %v1153_v47, %s5039_s17 }
 0x128   :  { %v5521_v1 = vpack.c.bf16 %v685_v42, %v684_v11 }
 0x129   :  { %v4331_v34 = vpop.f32.mrb[40].mxu0  ;;  %v5524_v33 = vpack.c.bf16 %v683_v12, %v682_v31 }
 0x12a   :  { %6753 = vst [vmem:[#allocation15_spill] sm:$0xff] %v5521_v1  ;;  %v5527_v6 = vadd.f32 %v4331_v34, %v5214_v35  ;;  %v551_v19 = vpop.f32.mrb[41].mxu0  ;;  %1234 = vrot.lane.b32.xlu1 %v1155_v63, %s5039_s17  ;;  %v1139_v63 = vrot.slane %v5521_v1, 1 }
 0x12b   :  { %6754 = vst [vmem:[#allocation16_spill] sm:$0xff] %v5524_v33  ;;  %v5531_v5 = vadd.f32 %v5214_v35, %v551_v19  ;;  %v4332_v20 = vpop.f32.mrb[42].mxu0  ;;  %1188 = vrot.lane.b32.xlu0 %v5524_v33, %s5038_s16  ;;  %v1138_v42 = vrot.slane %v5524_v33, 1 }
 0x12c   :  { %6755 = vst [vmem:[#allocation17_spill] sm:$0xff] %v5527_v6  ;;  %v688_v11 = vmax.f32 %v5527_v6, 0.0  ;;  %v5538_v12 = vadd.f32 %v4332_v20, %v5214_v35  ;;  %v554_v31 = vpop.f32.mrb[43].mxu0 }
 0x12d   :  { %6756 = vst [vmem:[#allocation18_spill] sm:$0xff] %v5531_v5  ;;  %v686_v34 = vmax.f32 %v5531_v5, 0.0  ;;  %v5542_v47 = vadd.f32 %v5214_v35, %v554_v31  ;;  %v1157_v19 = vsel %vm856_vm3, %v1138_v42, 0  ;;  %v1159_v5 = vsel %vm856_vm3, %v1139_v63, 0 }
 0x12e   :  { %6757 = vst [vmem:[#allocation19_spill] sm:$0xff] %v5538_v12  ;;  %v689_v57 = vmax.f32 %v5538_v12, 0.0  ;;  %1190 = vrot.lane.b32.xlu1 %v5521_v1, %s5038_s16 }
 0x12f   :  { %6758 = vst [vmem:[#allocation20_spill] sm:$0xff] %v5542_v47  ;;  %v687_v33 = vmax.f32 %v5542_v47, 0.0  ;;  %1236 = vrot.lane.b32.xlu0 %v1157_v19, %s5039_s17 }
 0x130   :  { %v5551_v20 = vpack.c.bf16 %v689_v57, %v688_v11 }
 0x131   :  { %v4335_v6 = vpop.f32.mrb[44].mxu0  ;;  %v5554_v31 = vpack.c.bf16 %v687_v33, %v686_v34 }
 0x132   :  { %6759 = vst [vmem:[#allocation21_spill] sm:$0xff] %v5551_v20  ;;  %v5557_v42 = vadd.f32 %v4335_v6, %v5214_v35  ;;  %v567_v16 = vpop.f32.mrb[45].mxu0  ;;  %1238 = vrot.lane.b32.xlu1 %v1159_v5, %s5039_s17  ;;  %v1141_v5 = vrot.slane %v5551_v20, 1 }
 0x133   :  { %6760 = vst [vmem:[#allocation22_spill] sm:$0xff] %v5554_v31  ;;  %v5561_v12 = vadd.f32 %v5214_v35, %v567_v16  ;;  %v4336_v1 = vpop.f32.mrb[46].mxu0  ;;  %1192 = vrot.lane.b32.xlu0 %v5554_v31, %s5038_s16  ;;  %v1140_v11 = vrot.slane %v5554_v31, 1 }
 0x134   :  { %6761 = vst [vmem:[#allocation23_spill] sm:$0xff] %v5557_v42  ;;  %v692_v19 = vmax.f32 %v5557_v42, 0.0  ;;  %v5568_v33 = vadd.f32 %v4336_v1, %v5214_v35  ;;  %v570_v34 = vpop.f32.mrb[47].mxu0 }
 0x135   :  { %6762 = vst [vmem:[#allocation24_spill] sm:$0xff] %v5561_v12  ;;  %v690_v6 = vmax.f32 %v5561_v12, 0.0  ;;  %v5572_v63 = vadd.f32 %v5214_v35, %v570_v34  ;;  %v1161_v16 = vsel %vm856_vm3, %v1140_v11, 0  ;;  %v1163_v12 = vsel %vm856_vm3, %v1141_v5, 0 }
 0x136   :  { %6763 = vst [vmem:[#allocation25_spill] sm:$0xff] %v5568_v33  ;;  %v693_v57 = vmax.f32 %v5568_v33, 0.0  ;;  %1194 = vrot.lane.b32.xlu1 %v5551_v20, %s5038_s16 }
 0x137   :  { %6764 = vst [vmem:[#allocation26_spill] sm:$0xff] %v5572_v63  ;;  %v691_v31 = vmax.f32 %v5572_v63, 0.0  ;;  %1240 = vrot.lane.b32.xlu0 %v1161_v16, %s5039_s17 }
 0x138   :  { %v5581_v1 = vpack.c.bf16 %v693_v57, %v692_v19 }
 0x139   :  { %v4339_v42 = vpop.f32.mrb[48].mxu0  ;;  %v5584_v34 = vpack.c.bf16 %v691_v31, %v690_v6 }
 0x13a   :  { %6765 = vst [vmem:[#allocation27_spill] sm:$0xff] %v5581_v1  ;;  %v5587_v11 = vadd.f32 %v4339_v42, %v5214_v35  ;;  %v583_v47 = vpop.f32.mrb[49].mxu0  ;;  %1242 = vrot.lane.b32.xlu1 %v1163_v12, %s5039_s17 }
 0x13b   :  { %6766 = vst [vmem:[#allocation28_spill] sm:$0xff] %v5584_v34  ;;  %v5591_v33 = vadd.f32 %v5214_v35, %v583_v47  ;;  %v4340_v20 = vpop.f32.mrb[50].mxu0  ;;  %1196 = vrot.lane.b32.xlu0 %v5584_v34, %s5038_s16  ;;  %v1142_v19 = vrot.slane %v5584_v34, 1  ;;  %v1143_v47 = vrot.slane %v5581_v1, 1 }
 0x13c   :  { %6767 = vst [vmem:[#allocation29_spill] sm:$0xff] %v5587_v11  ;;  %v696_v16 = vmax.f32 %v5587_v11, 0.0  ;;  %v5598_v31 = vadd.f32 %v4340_v20, %v5214_v35  ;;  %v586_v6 = vpop.f32.mrb[51].mxu0 }
 0x13d   :  { %6768 = vst [vmem:[#allocation30_spill] sm:$0xff] %v5591_v33  ;;  %v694_v42 = vmax.f32 %v5591_v33, 0.0  ;;  %v5602_v5 = vadd.f32 %v5214_v35, %v586_v6  ;;  %v1165_v12 = vsel %vm856_vm3, %v1142_v19, 0  ;;  %v1167_v33 = vsel %vm856_vm3, %v1143_v47, 0 }
 0x13e   :  { %6769 = vst [vmem:[#allocation31_spill] sm:$0xff] %v5598_v31  ;;  %v697_v57 = vmax.f32 %v5598_v31, 0.0  ;;  %1198 = vrot.lane.b32.xlu1 %v5581_v1, %s5038_s16 }
 0x13f   :  { %6770 = vst [vmem:[#allocation32_spill] sm:$0xff] %v5602_v5  ;;  %v695_v34 = vmax.f32 %v5602_v5, 0.0  ;;  %1244 = vrot.lane.b32.xlu0 %v1165_v12, %s5039_s17 }
 0x140   :  { %v5611_v20 = vpack.c.bf16 %v697_v57, %v696_v16 }
 0x141   :  { %v4343_v11 = vpop.f32.mrb[52].mxu0  ;;  %v5614_v6 = vpack.c.bf16 %v695_v34, %v694_v42 }
 0x142   :  { %6771 = vst [vmem:[#allocation33_spill] sm:$0xff] %v5611_v20  ;;  %v5617_v19 = vadd.f32 %v4343_v11, %v5214_v35  ;;  %v599_v63 = vpop.f32.mrb[53].mxu0  ;;  %1246 = vrot.lane.b32.xlu1 %v1167_v33, %s5039_s17 }
 0x143   :  { %6772 = vst [vmem:[#allocation34_spill] sm:$0xff] %v5614_v6  ;;  %v5621_v31 = vadd.f32 %v5214_v35, %v599_v63  ;;  %v4344_v1 = vpop.f32.mrb[54].mxu0  ;;  %1200 = vrot.lane.b32.xlu0 %v5614_v6, %s5038_s16  ;;  %v1144_v16 = vrot.slane %v5614_v6, 1  ;;  %v1145_v63 = vrot.slane %v5611_v20, 1 }
 0x144   :  { %6773 = vst [vmem:[#allocation35_spill] sm:$0xff] %v5617_v19  ;;  %v700_v12 = vmax.f32 %v5617_v19, 0.0  ;;  %v5628_v34 = vadd.f32 %v4344_v1, %v5214_v35  ;;  %v602_v42 = vpop.f32.mrb[55].mxu0 }
 0x145   :  { %6774 = vst [vmem:[#allocation36_spill] sm:$0xff] %v5621_v31  ;;  %v698_v11 = vmax.f32 %v5621_v31, 0.0  ;;  %v5632_v47 = vadd.f32 %v5214_v35, %v602_v42  ;;  %v1169_v33 = vsel %vm856_vm3, %v1144_v16, 0  ;;  %v1171_v31 = vsel %vm856_vm3, %v1145_v63, 0 }
 0x146   :  { %6775 = vst [vmem:[#allocation37_spill] sm:$0xff] %v5628_v34  ;;  %v701_v57 = vmax.f32 %v5628_v34, 0.0  ;;  %1202 = vrot.lane.b32.xlu1 %v5611_v20, %s5038_s16 }
 0x147   :  { %6776 = vst [vmem:[#allocation38_spill] sm:$0xff] %v5632_v47  ;;  %v699_v6 = vmax.f32 %v5632_v47, 0.0  ;;  %1248 = vrot.lane.b32.xlu0 %v1169_v33, %s5039_s17 }
 0x148   :  { %v5641_v1 = vpack.c.bf16 %v701_v57, %v700_v12 }
 0x149   :  { %v4347_v19 = vpop.f32.mrb[56].mxu0  ;;  %v5644_v42 = vpack.c.bf16 %v699_v6, %v698_v11 }
 0x14a   :  { %6777 = vst [vmem:[#allocation39_spill] sm:$0xff] %v5641_v1  ;;  %v5647_v16 = vadd.f32 %v4347_v19, %v5214_v35  ;;  %v615_v5 = vpop.f32.mrb[57].mxu0  ;;  %1250 = vrot.lane.b32.xlu1 %v1171_v31, %s5039_s17 }
 0x14b   :  { %6778 = vst [vmem:[#allocation40_spill] sm:$0xff] %v5644_v42  ;;  %v5651_v34 = vadd.f32 %v5214_v35, %v615_v5  ;;  %v4348_v20 = vpop.f32.mrb[58].mxu0  ;;  %1204 = vrot.lane.b32.xlu0 %v5644_v42, %s5038_s16  ;;  %v1146_v12 = vrot.slane %v5644_v42, 1  ;;  %v1147_v5 = vrot.slane %v5641_v1, 1 }
 0x14c   :  { %6779 = vst [vmem:[#allocation41_spill] sm:$0xff] %v5647_v16  ;;  %v704_v33 = vmax.f32 %v5647_v16, 0.0  ;;  %v5658_v6 = vadd.f32 %v4348_v20, %v5214_v35  ;;  %v618_v11 = vpop.f32.mrb[59].mxu0 }
 0x14d   :  { %6780 = vst [vmem:[#allocation42_spill] sm:$0xff] %v5651_v34  ;;  %v702_v19 = vmax.f32 %v5651_v34, 0.0  ;;  %v5662_v63 = vadd.f32 %v5214_v35, %v618_v11  ;;  %v1173_v31 = vsel %vm856_vm3, %v1146_v12, 0  ;;  %v1175_v34 = vsel %vm856_vm3, %v1147_v5, 0 }
 0x14e   :  { %6781 = vst [vmem:[#allocation43_spill] sm:$0xff] %v5658_v6  ;;  %v705_v57 = vmax.f32 %v5658_v6, 0.0  ;;  %1206 = vrot.lane.b32.xlu1 %v5641_v1, %s5038_s16 }
 0x14f   :  { %6782 = vst [vmem:[#allocation44_spill] sm:$0xff] %v5662_v63  ;;  %v703_v42 = vmax.f32 %v5662_v63, 0.0  ;;  %1252 = vrot.lane.b32.xlu0 %v1173_v31, %s5039_s17 }
 0x150   :  { %v5671_v20 = vpack.c.bf16 %v705_v57, %v704_v33  ;;  %v790_v33 = vrot.slane %v5237_v51, 7 }
 0x151   :  { %v4351_v16 = vpop.f32.mrb[60].mxu0  ;;  %v5674_v11 = vpack.c.bf16 %v703_v42, %v702_v19 }
 0x152   :  { %6783 = vst [vmem:[#allocation45_spill] sm:$0xff] %v5671_v20  ;;  %v5677_v12 = vadd.f32 %v4351_v16, %v5214_v35  ;;  %v631_v47 = vpop.f32.mrb[61].mxu0  ;;  %1254 = vrot.lane.b32.xlu1 %v1175_v34, %s5039_s17  ;;  %v1149_v51 = vrot.slane %v5671_v20, 1 }
 0x153   :  { %6784 = vst [vmem:[#allocation46_spill] sm:$0xff] %v5674_v11  ;;  %v5681_v6 = vadd.f32 %v5214_v35, %v631_v47  ;;  %v4352_v1 = vpop.f32.mrb[62].mxu0  ;;  %1208 = vrot.lane.b32.xlu0 %v5674_v11, %s5038_s16  ;;  %v1148_v31 = vrot.slane %v5674_v11, 1 }
 0x154   :  { %6785 = vst [vmem:[#allocation47_spill] sm:$0xff] %v5677_v12  ;;  %v708_v42 = vmax.f32 %v5677_v12, 0.0  ;;  %v5689_v19 = vadd.f32 %v4352_v1, %v5214_v35  ;;  %v634_v16 = vpop.f32.mrb[63].mxu0  ;;  %v809_v12 = vsel %vm806_vm5, 0, %v790_v33  ;;  %v1179_v21 = vsel %vm856_vm3, %v1149_v51, 0 }
 0x155   :  { %6786 = vst [vmem:[#allocation48_spill] sm:$0xff] %v5681_v6  ;;  %v706_v34 = vmax.f32 %v5681_v6, 0.0  ;;  %v5693_v47 = vadd.f32 %v5214_v35, %v634_v16  ;;  %v890_v5 = vpop.permute.xlu0 %889  ;;  %v1177_v57 = vsel %vm856_vm3, %v1148_v31, 0  ;;  %v791_v35 = vrot.slane %v5232_v48, 7 }
 0x156   :  { %6787 = vst [vmem:[#allocation49_spill] sm:$0xff] %v5689_v19  ;;  %v709_v11 = vmax.f32 %v5689_v19, 0.0  ;;  %1210 = vrot.lane.b32.xlu1 %v5671_v20, %s5038_s16  ;;  %v971_v16 = vsel %vm969_vm6, %v809_v12, %v890_v5 }
 0x157   :  { %v707_v1 = vmax.f32 %v5693_v47, 0.0  ;;  %1256 = vrot.lane.b32.xlu0 %v1177_v57, %s5039_s17  ;;  %v811_v33 = vsel %vm806_vm5, 0, %v791_v35 }
 0x158   :  { %v938_v6 = vpop.permute.xlu1 %937  ;;  %v5705_v31 = vpack.c.bf16 %v709_v11, %v708_v42 }
 0x159   :  { %v1004_v63 = vsel %vm1002_vm7, %v971_v16, %v938_v6  ;;  %v892_v19 = vpop.permute.xlu0 %891  ;;  %v5709_v20 = vpack.c.bf16 %v707_v1, %v706_v34  ;;  %v792_v6 = vrot.slane %v5276_v7, 7  ;;  %v4775_v7 = vpack.i.bf16 %v5226_v43, %v5220_v39 }
 0x15a   :  { %1054 = vst.msk [vmem:[#allocation2 + $0x10] sm:$0xff] %vm1051_vm4, %v1004_v63  ;;  %1258 = vrot.lane.b32.xlu1 %v1179_v21, %s5039_s17  ;;  %v973_v11 = vsel %vm969_vm6, %v811_v33, %v892_v19  ;;  %v1151_v63 = vrot.slane %v5705_v31, 1  ;;  %v793_v21 = vrot.slane %v5271_v4, 7  ;;  %v4780_v39 = vpack.i.bf16 %v5223_v41, %v5217_v37 }
 0x15b   :  { %1212 = vrot.lane.b32.xlu0 %v5709_v20, %s5038_s16  ;;  %v1150_v48 = vrot.slane %v5709_v20, 1  ;;  %v813_v19 = vsel %vm806_vm5, 0, %v792_v6  ;;  %v795_v37 = vrot.slane %v5303_v22, 7  ;;  %v5777_v22 = vld [vmem:[%s6689_s3 + $0x18] sm:$0xff]  }
 0x15c   :  { %v940_v12 = vpop.permute.xlu1 %939  ;;  %v1183_v35 = vsel %vm856_vm3, %v1151_v63, 0  ;;  %v815_v4 = vsel %vm806_vm5, 0, %v793_v21  ;;  %v4790_v63 = vpack.i.bf16 %v5253_v59, %v5240_v52 }
 0x15d   :  { %v1007_v42 = vsel %vm1002_vm7, %v973_v11, %v940_v12  ;;  %v894_v34 = vpop.permute.xlu0 %893  ;;  %v1181_v5 = vsel %vm856_vm3, %v1150_v48, 0  ;;  %v794_v11 = vrot.slane %v5306_v25, 7  ;;  %v5748_v12 = vld [vmem:[%s6689_s3 + $0x8] ss:$0 sps:$4 sm:$0xff]  }
 0x15e   :  { %1055 = vst.msk [vmem:[#allocation2 + $0x18] sm:$0xff] %vm1051_vm4, %v1007_v42  ;;  %1214 = vrot.lane.b32.xlu1 %v5705_v31, %s5038_s16  ;;  %v975_v51 = vsel %vm969_vm6, %v813_v19, %v894_v34 }
 0x15f   :  { %1260 = vrot.lane.b32.xlu0 %v1181_v5, %s5039_s17  ;;  %v4785_v5 = vpack.i.bf16 %v5257_v62, %v5246_v55  ;;  %v817_v41 = vsel %vm806_vm5, 0, %v794_v11  ;;  %v4795_v55 = vpack.i.bf16 %v5294_v17, %v5283_v10  ;;  %v819_v10 = vsel %vm806_vm5, 0, %v795_v37 }
 0x160   :  { %v896_v57 = vpop.permute.xlu1 %895  ;;  %v4800_v17 = vpack.i.bf16 %v5290_v14, %v5279_v8  ;;  %v797_v8 = vrot.slane %v5333_v45, 7  ;;  %v4830_v37 = vpack.i.bf16 %v5380_v23, %v5369_v15  ;;  %v800_v15 = vrot.slane %v5396_v44, 7 }
 0x161   :  { %v942_v1 = vpop.permute.xlu0 %941  ;;  %v5732_v16 = vld [vmem:[#allocation2 + $0x10] sm:$0xff]  ;;  %v977_v43 = vsel %vm969_vm6, %v815_v4, %v896_v57  ;;  %v4810_v4 = vpack.i.bf16 %v5320_v32, %v5309_v26  ;;  %v4820_v26 = vpack.i.bf16 %v5350_v60, %v5339_v50  ;;  %v799_v50 = vrot.slane %v5363_v9, 7 }
 0x162   :  { %v1010_v33 = vsel %vm1002_vm7, %v975_v51, %v942_v1  ;;  %1262 = vrot.lane.b32.xlu1 %v1183_v35, %s5039_s17  ;;  %4357 = vmatprep.mubr.msk.bf16.mxu1 %vm1051_vm4, %v5732_v16  ;;  %v823_v45 = vsel %vm806_vm5, 0, %v797_v8  ;;  %v801_v44 = vrot.slane %v5393_v38, 7 }
 0x163   :  { %1056 = vst.msk [vmem:[#allocation2 + $0x20] sm:$0xff] %vm1051_vm4, %v1010_v33  ;;  %4776 = vrot.lane.b32.xlu0 %v4775_v7, %s5041_s20  ;;  %v796_v7 = vrot.slane %v5336_v49, 7  ;;  %v4805_v33 = vpack.i.bf16 %v5324_v36, %v5313_v28  ;;  %v827_v9 = vsel %vm806_vm5, 0, %v799_v50 }
 0x164   :  { %v944_v48 = vpop.permute.xlu1 %943  ;;  %v831_v38 = vsel %vm806_vm5, 0, %v801_v44 }
 0x165   :  { %v1013_v6 = vsel %vm1002_vm7, %v977_v43, %v944_v48  ;;  %v898_v42 = vpop.permute.xlu0 %897  ;;  %v5751_v34 = vld [vmem:[#allocation2 + $0x18] sm:$0xff]  ;;  %v821_v14 = vsel %vm806_vm5, 0, %v796_v7 }
 0x166   :  { %1057 = vst.msk [vmem:[#allocation2 + $0x28] sm:$0xff] %vm1051_vm4, %v1013_v6  ;;  %4781 = vrot.lane.b32.xlu1 %v4780_v39, %s5041_s20  ;;  %4358 = vmatmul.mubr.msk.bf16.vlgmr.msra.gmra.mrb[0].mxu1 %vm1051_vm4, %v5751_v34  ;;  %v979_v62 = vsel %vm969_vm6, %v817_v41, %v898_v42  ;;  %v4815_v39 = vpack.i.bf16 %v5354_v0, %v5343_v54  ;;  %v798_v0 = vrot.slane %v5366_v13, 7 }
 0x167   :  { %4390 = vmatpush3.bf16.msra.mxu1 %v5266_v2  ;;  %4786 = vrot.lane.b32.xlu0 %v4785_v5, %s5041_s20  ;;  %v5772_v2 = vsel %vm1466_vm2, %v5748_v12, 0  ;;  %v4825_v5 = vpack.i.bf16 %v5384_v29, %v5373_v18  ;;  %v4835_v29 = vpack.i.bf16 %v5414_v3, %v5403_v53  ;;  %v4840_v3 = vpack.i.bf16 %v5410_v61, %v5399_v46 }
 0x168   :  { %v900_v25 = vpop.permute.xlu1 %899  ;;  %4765 = vmatprep.subr.msk.bf16.mxu1 %vm1466_vm2, %v5748_v12  ;;  %v825_v60 = vsel %vm806_vm5, 0, %v798_v0  ;;  %v829_v46 = vsel %vm806_vm5, 0, %v800_v15  ;;  %v6800_v15 = vld [vmem:[#allocation19_spill] sm:$0xff] }
 0x169   :  { %v946_v21 = vpop.permute.xlu0 %945  ;;  %v981_v19 = vsel %vm969_vm6, %v819_v10, %v900_v25  ;;  %v4850_v10 = vpack.i.bf16 %v5440_v40, %v5429_v24  ;;  %v6788_v24 = vld [vmem:[#allocation4_spill] sm:$0xff] }
 0x16a   :  { %v1016_v52 = vsel %vm1002_vm7, %v979_v62, %v946_v21  ;;  %4791 = vrot.lane.b32.xlu1 %v4790_v63, %s5041_s20  ;;  %v5781_v59 = vld [vmem:[#allocation2 + $0x20] sm:$0xff]  ;;  %v802_v40 = vrot.slane %v6788_v24, 7 }
 0x16b   :  { %1058 = vst.msk [vmem:[#allocation2 + $0x30] sm:$0xff] %vm1051_vm4, %v1016_v52  ;;  %4796 = vrot.lane.b32.xlu0 %v4795_v55, %s5041_s20  ;;  %4361 = vmatprep.mubr.msk.bf16.mxu1 %vm1051_vm4, %v5781_v59  ;;  %v4845_v52 = vpack.i.bf16 %v5444_v56, %v5433_v30  ;;  %v4855_v56 = vpack.i.bf16 %v5474_v58, %v5463_v27  ;;  %v6789_v58 = vld [vmem:[#allocation7_spill] sm:$0xff] }
 0x16c   :  { %v948_v57 = vpop.permute.xlu1 %947  ;;  %4392 = vmatpush3.bf16.msra.mxu1 %v5772_v2 }
 0x16d   :  { %v1019_v51 = vsel %vm1002_vm7, %v981_v19, %v948_v57  ;;  %v902_v1 = vpop.permute.xlu0 %901  ;;  %v5794_v35 = vld [vmem:[#allocation2 + $0x28] sm:$0xff]  ;;  %4425 = vmatprep.subr.bf16.mxu1 %v5777_v22 }
 0x16e   :  { %1059 = vst.msk [vmem:[#allocation2 + $0x38] sm:$0xff] %vm1051_vm4, %v1019_v51  ;;  %4801 = vrot.lane.b32.xlu1 %v4800_v17, %s5041_s20  ;;  %4362 = vmatmul.mubr.msk.bf16.gmra.mrb[4].mxu1 %vm1051_vm4, %v5794_v35  ;;  %v983_v28 = vsel %vm969_vm6, %v821_v14, %v902_v1  ;;  %v6790_v51 = vld [vmem:[#allocation8_spill] sm:$0xff] }
 0x16f   :  { %4806 = vrot.lane.b32.xlu0 %v4805_v33, %s5041_s20  ;;  %v4860_v1 = vpack.i.bf16 %v6790_v51, %v6789_v58 }
 0x170   :  { %v904_v49 = vpop.permute.xlu1 %903 }
 0x171   :  { %v950_v36 = vpop.permute.xlu0 %949  ;;  %v985_v32 = vsel %vm969_vm6, %v823_v45, %v904_v49  ;;  %v6791_v49 = vld [vmem:[#allocation12_spill] sm:$0xff] }
 0x172   :  { %v1022_v43 = vsel %vm1002_vm7, %v983_v28, %v950_v36  ;;  %4811 = vrot.lane.b32.xlu1 %v4810_v4, %s5041_s20  ;;  %v5813_v48 = vld [vmem:[#allocation2 + $0x30] sm:$0xff]  ;;  %v6792_v4 = vld [vmem:[#allocation14_spill] sm:$0xff]  ;;  %v6793_v36 = vld [vmem:[#allocation3_spill] sm:$0xff] }
 0x173   :  { %1060 = vst.msk [vmem:[#allocation2 + $0x40] sm:$0xff] %vm1051_vm4, %v1022_v43  ;;  %4816 = vrot.lane.b32.xlu0 %v4815_v39, %s5041_s20  ;;  %4365 = vmatprep.mubr.msk.bf16.mxu1 %vm1051_vm4, %v5813_v48  ;;  %v4865_v28 = vpack.i.bf16 %v6792_v4, %v6791_v49  ;;  %v803_v39 = vrot.slane %v6793_v36, 7  ;;  %v833_v43 = vsel %vm806_vm5, 0, %v802_v40  ;;  %v6806_v40 = vld [vmem:[#allocation30_spill] sm:$0xff]  ;;  %v6810_v36 = vld [vmem:[#allocation31_spill] sm:$0xff] }
 0x174   :  { %v952_v54 = vpop.permute.xlu1 %951 }
 0x175   :  { %v1025_v11 = vsel %vm1002_vm7, %v985_v32, %v952_v54  ;;  %v906_v6 = vpop.permute.xlu0 %905  ;;  %v5825_v42 = vld [vmem:[#allocation2 + $0x38] sm:$0xff]  ;;  %v6795_v32 = vld [vmem:[#allocation13_spill] sm:$0xff] }
 0x176   :  { %1061 = vst.msk [vmem:[#allocation2 + $0x48] sm:$0xff] %vm1051_vm4, %v1025_v11  ;;  %4821 = vrot.lane.b32.xlu1 %v4820_v26, %s5041_s20  ;;  %4366 = vmatmul.mubr.msk.bf16.gmra.mrb[8].mxu1 %vm1051_vm4, %v5825_v42  ;;  %v987_v41 = vsel %vm969_vm6, %v825_v60, %v906_v6  ;;  %v6794_v26 = vld [vmem:[#allocation11_spill] sm:$0xff]  ;;  %v6796_v6 = vld [vmem:[#allocation18_spill] sm:$0xff] }
 0x177   :  { %4826 = vrot.lane.b32.xlu0 %v4825_v5, %s5041_s20  ;;  %v4870_v54 = vpack.i.bf16 %v6795_v32, %v6794_v26  ;;  %v6797_v5 = vld [vmem:[#allocation20_spill] sm:$0xff] }
 0x178   :  { %v908_v13 = vpop.permute.xlu1 %907  ;;  %v4875_v50 = vpack.i.bf16 %v6797_v5, %v6796_v6  ;;  %v6811_v32 = vld [vmem:[#allocation36_spill] sm:$0xff] }
 0x179   :  { %v954_v18 = vpop.permute.xlu0 %953  ;;  %v989_v23 = vsel %vm969_vm6, %v827_v9, %v908_v13  ;;  %v6799_v9 = vld [vmem:[#allocation17_spill] sm:$0xff] }
 0x17a   :  { %v1028_v25 = vsel %vm1002_vm7, %v987_v41, %v954_v18  ;;  %4831 = vrot.lane.b32.xlu1 %v4830_v37, %s5041_s20  ;;  %v5843_v63 = vld [vmem:[#allocation2 + $0x40] sm:$0xff]  ;;  %v835_v37 = vsel %vm806_vm5, 0, %v803_v39  ;;  %v6798_v41 = vld [vmem:[#allocation6_spill] sm:$0xff] }
 0x17b   :  { %1062 = vst.msk [vmem:[#allocation2 + $0x50] sm:$0xff] %vm1051_vm4, %v1028_v25  ;;  %4836 = vrot.lane.b32.xlu0 %v4835_v29, %s5041_s20  ;;  %4369 = vmatprep.mubr.msk.bf16.mxu1 %vm1051_vm4, %v5843_v63  ;;  %v804_v18 = vrot.slane %v6798_v41, 7 }
 0x17c   :  { %v956_v53 = vpop.permute.xlu1 %955 }
 0x17d   :  { %v1031_v55 = vsel %vm1002_vm7, %v989_v23, %v956_v53  ;;  %v910_v62 = vpop.permute.xlu0 %909  ;;  %v5855_v21 = vld [vmem:[#allocation2 + $0x48] sm:$0xff]  ;;  %v4880_v23 = vpack.i.bf16 %v6800_v15, %v6799_v9 }
 0x17e   :  { %1063 = vst.msk [vmem:[#allocation2 + $0x58] sm:$0xff] %vm1051_vm4, %v1031_v55  ;;  %4841 = vrot.lane.b32.xlu1 %v4840_v3, %s5041_s20  ;;  %4370 = vmatmul.mubr.msk.bf16.gmra.mrb[12].mxu1 %vm1051_vm4, %v5855_v21  ;;  %v991_v17 = vsel %vm969_vm6, %v829_v46, %v910_v62  ;;  %v6801_v62 = vld [vmem:[#allocation24_spill] sm:$0xff]  ;;  %v6803_v46 = vld [vmem:[#allocation5_spill] sm:$0xff] }
 0x17f   :  { %4846 = vrot.lane.b32.xlu0 %v4845_v52, %s5041_s20  ;;  %v6802_v52 = vld [vmem:[#allocation26_spill] sm:$0xff]  ;;  %v6817_v9 = vld [vmem:[#allocation44_spill] sm:$0xff] }
 0x180   :  { %v912_v61 = vpop.permute.xlu1 %911  ;;  %v4885_v44 = vpack.i.bf16 %v6802_v52, %v6801_v62  ;;  %v6818_v62 = vld [vmem:[#allocation16_spill] sm:$0xff] }
 0x181   :  { %v958_v30 = vpop.permute.xlu0 %957  ;;  %v993_v7 = vsel %vm969_vm6, %v831_v38, %v912_v61  ;;  %v805_v61 = vrot.slane %v6803_v46, 7  ;;  %v1090_v52 = vrot.slane %v6818_v62, 7 }
 0x182   :  { %v1034_v19 = vsel %vm1002_vm7, %v991_v17, %v958_v30  ;;  %4851 = vrot.lane.b32.xlu1 %v4850_v10, %s5041_s20  ;;  %v5873_v57 = vld [vmem:[#allocation2 + $0x50] sm:$0xff]  ;;  %v837_v10 = vsel %vm806_vm5, 0, %v804_v18  ;;  %v6804_v30 = vld [vmem:[#allocation23_spill] sm:$0xff] }
 0x183   :  { %1064 = vst.msk [vmem:[#allocation2 + $0x60] sm:$0xff] %vm1051_vm4, %v1034_v19  ;;  %4856 = vrot.lane.b32.xlu0 %v4855_v56, %s5041_s20  ;;  %4373 = vmatprep.mubr.msk.bf16.mxu1 %vm1051_vm4, %v5873_v57  ;;  %v6805_v56 = vld [vmem:[#allocation25_spill] sm:$0xff] }
 0x184   :  { %v960_v27 = vpop.permute.xlu1 %959  ;;  %v4890_v19 = vpack.i.bf16 %v6805_v56, %v6804_v30  ;;  %v1376_v30 = vld [vmem:[#allocation2] sm:$0xff] }
 0x185   :  { %v1037_v33 = vsel %vm1002_vm7, %v993_v7, %v960_v27  ;;  %v914_v8 = vpop.permute.xlu0 %913  ;;  %v5885_v14 = vld [vmem:[#allocation2 + $0x58] sm:$0xff]  ;;  %v6807_v7 = vld [vmem:[#allocation32_spill] sm:$0xff] }
 0x186   :  { %1065 = vst.msk [vmem:[#allocation2 + $0x68] sm:$0xff] %vm1051_vm4, %v1037_v33  ;;  %4861 = vrot.lane.b32.xlu1 %v4860_v1, %s5041_s20  ;;  %4374 = vmatmul.mubr.msk.bf16.gmra.mrb[16].mxu1 %vm1051_vm4, %v5885_v14  ;;  %v995_v0 = vsel %vm969_vm6, %v833_v43, %v914_v8  ;;  %v4895_v27 = vpack.i.bf16 %v6807_v7, %v6806_v40  ;;  %v839_v1 = vsel %vm806_vm5, 0, %v805_v61  ;;  %v6808_v33 = vld [vmem:[#allocation10_spill] sm:$0xff]  ;;  %v6819_v61 = vld [vmem:[#allocation41_spill] sm:$0xff]  ;;  %v6822_v7 = vld [vmem:[#allocation15_spill] sm:$0xff] }
 0x187   :  { %4866 = vrot.lane.b32.xlu0 %v4865_v28, %s5041_s20  ;;  %v1088_v8 = vrot.slane %v6808_v33, 7  ;;  %v6809_v28 = vld [vmem:[#allocation29_spill] sm:$0xff]  ;;  %v6823_v33 = vld [vmem:[#allocation47_spill] sm:$0xff] }
 0x188   :  { %v916_v45 = vpop.permute.xlu1 %915  ;;  %v4900_v39 = vpack.i.bf16 %v6810_v36, %v6809_v28 }
 0x189   :  { %v962_v11 = vpop.permute.xlu0 %961  ;;  %v997_v29 = vsel %vm969_vm6, %v835_v37, %v916_v45  ;;  %v1105_v5 = vsel %vm806_vm5, 0, %v1088_v8  ;;  %v6815_v37 = vld [vmem:[#allocation37_spill] sm:$0xff] }
 0x18a   :  { %v1040_v60 = vsel %vm1002_vm7, %v995_v0, %v962_v11  ;;  %4871 = vrot.lane.b32.xlu1 %v4870_v54, %s5041_s20  ;;  %v5903_v13 = vld [vmem:[#allocation2 + $0x60] sm:$0xff]  ;;  %v6812_v54 = vld [vmem:[#allocation38_spill] sm:$0xff]  ;;  %v6813_v11 = vld [vmem:[#allocation9_spill] sm:$0xff] }
 0x18b   :  { %1066 = vst.msk [vmem:[#allocation2 + $0x70] sm:$0xff] %vm1051_vm4, %v1040_v60  ;;  %4876 = vrot.lane.b32.xlu0 %v4875_v50, %s5041_s20  ;;  %4377 = vmatprep.mubr.msk.bf16.mxu1 %vm1051_vm4, %v5903_v13  ;;  %v4905_v0 = vpack.i.bf16 %v6812_v54, %v6811_v32  ;;  %v1089_v6 = vrot.slane %v6813_v11, 7  ;;  %v6814_v60 = vld [vmem:[#allocation35_spill] sm:$0xff]  ;;  %v6824_v8 = vld [vmem:[#allocation49_spill] sm:$0xff]  ;;  %v6825_v54 = vld [vmem:[#allocation22_spill] sm:$0xff] }
 0x18c   :  { %v964_v25 = vpop.permute.xlu1 %963  ;;  %v4910_v41 = vpack.i.bf16 %v6815_v37, %v6814_v60  ;;  %v6003_v11 = vld [vmem:[%s6689_s3 + $0x20] ss:$0 sps:$4 sm:$0xff]   ;;  %v6826_v37 = vld [vmem:[#allocation21_spill] sm:$0xff] }
 0x18d   :  { %v1043_v53 = vsel %vm1002_vm7, %v997_v29, %v964_v25  ;;  %v918_v3 = vpop.permute.xlu0 %917  ;;  %v5915_v55 = vld [vmem:[#allocation2 + $0x68] sm:$0xff]  ;;  %v6816_v25 = vld [vmem:[#allocation42_spill] sm:$0xff]  ;;  %v4973_v60 = vld [vmem:[%s6689_s3] sm:$0xff]  }
 0x18e   :  { %1067 = vst.msk [vmem:[#allocation2 + $0x78] sm:$0xff] %vm1051_vm4, %v1043_v53  ;;  %4881 = vrot.lane.b32.xlu1 %v4880_v23, %s5041_s20  ;;  %4378 = vmatmul.mubr.msk.bf16.gmra.mrb[20].mxu1 %vm1051_vm4, %v5915_v55  ;;  %v999_v38 = vsel %vm969_vm6, %v837_v10, %v918_v3  ;;  %v4915_v15 = vpack.i.bf16 %v6817_v9, %v6816_v25  ;;  %v1107_v3 = vsel %vm806_vm5, 0, %v1089_v6  ;;  %v6820_v10 = vld [vmem:[#allocation43_spill] sm:$0xff]  ;;  %v6024_v25 = vsel %vm1466_vm2, %v6003_v11, 0 }
 0x18f   :  { %4886 = vrot.lane.b32.xlu0 %v4885_v44, %s5041_s20 }
 0x190   :  { %v920_v17 = vpop.permute.xlu1 %919 }
 0x191   :  { %v966_v24 = vpop.permute.xlu0 %965  ;;  %v1001_v49 = vsel %vm969_vm6, %v839_v1, %v920_v17  ;;  %v4920_v17 = vpack.i.bf16 %v6820_v10, %v6819_v61 }
 0x192   :  { %v1046_v58 = vsel %vm1002_vm7, %v999_v38, %v966_v24  ;;  %4891 = vrot.lane.b32.xlu1 %v4890_v19, %s5041_s20  ;;  %v5933_v51 = vld [vmem:[#allocation2 + $0x70] sm:$0xff]  ;;  %v6821_v24 = vld [vmem:[#allocation48_spill] sm:$0xff] }
 0x193   :  { %1068 = vst.msk [vmem:[#allocation2 + $0x80] sm:$0xff] %vm1051_vm4, %v1046_v58  ;;  %4896 = vrot.lane.b32.xlu0 %v4895_v27, %s5041_s20  ;;  %4381 = vmatprep.mubr.msk.bf16.mxu1 %vm1051_vm4, %v5933_v51  ;;  %v4925_v40 = vpack.i.bf16 %v5693_v47, %v6821_v24  ;;  %v1091_v27 = vrot.slane %v6822_v7, 7  ;;  %v1109_v58 = vsel %vm806_vm5, 0, %v1090_v52 }
 0x194   :  { %v968_v4 = vpop.permute.xlu1 %967 }
 0x195   :  { %v1049_v43 = vsel %vm1002_vm7, %v1001_v49, %v968_v4  ;;  %v1185_v45 = vpop.permute.xlu0 %1184  ;;  %v5945_v26 = vld [vmem:[#allocation2 + $0x78] sm:$0xff]  ;;  %v4930_v49 = vpack.i.bf16 %v6824_v8, %v6823_v33 }
 0x196   :  { %1069 = vst.msk [vmem:[#allocation2 + $0x88] sm:$0xff] %vm1051_vm4, %v1049_v43  ;;  %4901 = vrot.lane.b32.xlu1 %v4900_v39, %s5041_s20  ;;  %4382 = vmatmul.mubr.msk.bf16.gmra.mrb[24].mxu1 %vm1051_vm4, %v5945_v26  ;;  %v1265_v18 = vsel %vm969_vm6, %v1105_v5, %v1185_v45  ;;  %v1111_v39 = vsel %vm806_vm5, 0, %v1091_v27  ;;  %v1377_v43 = vld [vmem:[#allocation2 + $0x8] sm:$0xff] }
 0x197   :  { %4906 = vrot.lane.b32.xlu0 %v4905_v0, %s5041_s20  ;;  %v1092_v0 = vrot.slane %v6825_v54, 7 }
 0x198   :  { %v1187_v50 = vpop.permute.xlu1 %1186 }
 0x199   :  { %v1233_v29 = vpop.permute.xlu0 %1232  ;;  %v1267_v44 = vsel %vm969_vm6, %v1107_v3, %v1187_v50 }
 0x19a   :  { %v1297_v23 = vsel %vm1002_vm7, %v1265_v18, %v1233_v29  ;;  %4911 = vrot.lane.b32.xlu1 %v4910_v41, %s5041_s20  ;;  %v5963_v53 = vld [vmem:[#allocation2 + $0x80] sm:$0xff]  ;;  %v1093_v41 = vrot.slane %v6826_v37, 7  ;;  %v1113_v18 = vsel %vm806_vm5, 0, %v1092_v0  ;;  %v6831_v37 = vld [vmem:[#allocation40_spill] sm:$0xff] }
 0x19b   :  { %1347 = vst.msk [vmem:[#allocation2 + $0xb0] sm:$0xff] %vm1051_vm4, %v1297_v23  ;;  %4916 = vrot.lane.b32.xlu0 %v4915_v15, %s5041_s20  ;;  %4385 = vmatprep.mubr.msk.bf16.mxu1 %vm1051_vm4, %v5963_v53 }
 0x19c   :  { %v1235_v46 = vpop.permute.xlu1 %1234 }
 0x19d   :  { %v1300_v56 = vsel %vm1002_vm7, %v1267_v44, %v1235_v46  ;;  %v1189_v19 = vpop.permute.xlu0 %1188  ;;  %v5975_v38 = vld [vmem:[#allocation2 + $0x88] sm:$0xff] }
 0x19e   :  { %1348 = vst.msk [vmem:[#allocation2 + $0xb8] sm:$0xff] %vm1051_vm4, %v1300_v56  ;;  %4921 = vrot.lane.b32.xlu1 %v4920_v17, %s5041_s20  ;;  %4386 = vmatmul.mubr.msk.bf16.gmra.mrb[28].mxu1 %vm1051_vm4, %v5975_v38  ;;  %v1269_v47 = vsel %vm969_vm6, %v1109_v58, %v1189_v19  ;;  %v6827_v44 = vld [vmem:[#allocation28_spill] sm:$0xff]  ;;  %v6828_v17 = vld [vmem:[#allocation27_spill] sm:$0xff] }
 0x19f   :  { %4926 = vrot.lane.b32.xlu0 %v4925_v40, %s5041_s20  ;;  %4393 = vmatprep.mubr.msk.bf16.mxu1 %vm1051_vm4, %v1376_v30  ;;  %v1094_v46 = vrot.slane %v6827_v44, 7 }
 0x1a0   :  { %v1191_v1 = vpop.permute.xlu1 %1190 }
 0x1a1   :  { %v1237_v4 = vpop.permute.xlu0 %1236  ;;  %v1271_v45 = vsel %vm969_vm6, %v1111_v39, %v1191_v1  ;;  %v1117_v30 = vsel %vm806_vm5, 0, %v1094_v46  ;;  %v6829_v1 = vld [vmem:[#allocation34_spill] sm:$0xff] }
 0x1a2   :  { %v1303_v28 = vsel %vm1002_vm7, %v1269_v47, %v1237_v4  ;;  %4931 = vrot.lane.b32.xlu1 %v4930_v49, %s5041_s20  ;;  %v5992_v36 = vld [vmem:[#allocation2 + $0xb0] sm:$0xff]  ;;  %v1096_v33 = vrot.slane %v6829_v1, 7 }
 0x1a3   :  { %1349 = vst.msk [vmem:[#allocation2 + $0xc0] sm:$0xff] %vm1051_vm4, %v1303_v28  ;;  %4465 = vmatprep.mubr.msk.bf16.mxu0 %vm1051_vm4, %v5992_v36  ;;  %v6830_v4 = vld [vmem:[#allocation33_spill] sm:$0xff] }
 0x1a4   :  { %v1239_v32 = vpop.permute.xlu1 %1238  ;;  %v1097_v28 = vrot.slane %v6830_v4, 7  ;;  %v1121_v39 = vsel %vm806_vm5, 0, %v1096_v33 }
 0x1a5   :  { %v1306_v6 = vsel %vm1002_vm7, %v1271_v45, %v1239_v32  ;;  %v1193_v5 = vpop.permute.xlu0 %1192  ;;  %v6006_v50 = vld [vmem:[#allocation2 + $0xb8] sm:$0xff] }
 0x1a6   :  { %1350 = vst.msk [vmem:[#allocation2 + $0xc8] sm:$0xff] %vm1051_vm4, %v1306_v6  ;;  %4394 = vmatmul.mubr.msk.bf16.vlgmr.msra.gmra.mrb[0].mxu1 %vm1051_vm4, %v1377_v43  ;;  %4466 = vmatmul.mubr.msk.bf16.vlgmr.msra.gmra.mrb[64].mxu0 %vm1051_vm4, %v6006_v50  ;;  %v1273_v9 = vsel %vm969_vm6, %v1113_v18, %v1193_v5  ;;  %v1123_v6 = vsel %vm806_vm5, 0, %v1097_v28 }
 0x1a7   :  { %4426 = vmatpush3.bf16.msra.mxu1 %v5777_v22  ;;  %4498 = vmatpush3.bf16.msra.mxu0 %v4973_v60 }
 0x1a8   :  { %4397 = vmatprep.mubr.msk.bf16.mxu1 %vm1051_vm4, %v5732_v16  ;;  %v1195_v29 = vpop.permute.xlu1 %1194  ;;  %4766 = vmatprep.subr.msk.bf16.mxu1 %vm1466_vm2, %v6003_v11  ;;  %v1115_v16 = vsel %vm806_vm5, 0, %v1093_v41  ;;  %v1098_v41 = vrot.slane %v6831_v37, 7 }
 0x1a9   :  { %v1241_v15 = vpop.permute.xlu0 %1240  ;;  %4768 = vmatprep.subr.msk.bf16.mxu0 %vm1466_vm2, %v5748_v12  ;;  %v1275_v62 = vsel %vm969_vm6, %v1115_v16, %v1195_v29 }
 0x1aa   :  { %v1309_v23 = vsel %vm1002_vm7, %v1273_v9, %v1241_v15  ;;  %v6030_v3 = vld [vmem:[#allocation2 + $0xc0] sm:$0xff]  ;;  %v1125_v16 = vsel %vm806_vm5, 0, %v1098_v41 }
 0x1ab   :  { %1351 = vst.msk [vmem:[#allocation2 + $0xd0] sm:$0xff] %vm1051_vm4, %v1309_v23  ;;  %4469 = vmatprep.mubr.msk.bf16.mxu0 %vm1051_vm4, %v6030_v3  ;;  %4428 = vmatpush3.bf16.msra.mxu1 %v6024_v25  ;;  %v6832_v15 = vld [vmem:[#allocation39_spill] sm:$0xff] }
 0x1ac   :  { %v1243_v52 = vpop.permute.xlu1 %1242  ;;  %4500 = vmatpush3.bf16.msra.mxu0 %v5772_v2  ;;  %v1095_v2 = vrot.slane %v6828_v17, 7  ;;  %v1099_v23 = vrot.slane %v6832_v15, 7 }
 0x1ad   :  { %v1312_v12 = vsel %vm1002_vm7, %v1275_v62, %v1243_v52  ;;  %v1197_v61 = vpop.permute.xlu0 %1196  ;;  %v6041_v10 = vld [vmem:[#allocation2 + $0xc8] sm:$0xff]  ;;  %4533 = vmatprep.subr.bf16.mxu0 %v5777_v22 }
 0x1ae   :  { %1352 = vst.msk [vmem:[#allocation2 + $0xd8] sm:$0xff] %vm1051_vm4, %v1312_v12  ;;  %4398 = vmatmul.mubr.msk.bf16.gmra.mrb[4].mxu1 %vm1051_vm4, %v5751_v34  ;;  %4470 = vmatmul.mubr.msk.bf16.gmra.mrb[68].mxu0 %vm1051_vm4, %v6041_v10  ;;  %v1277_v19 = vsel %vm969_vm6, %v1117_v30, %v1197_v61  ;;  %v1119_v34 = vsel %vm806_vm5, 0, %v1095_v2  ;;  %v1127_v61 = vsel %vm806_vm5, 0, %v1099_v23  ;;  %v6833_v30 = vld [vmem:[#allocation46_spill] sm:$0xff] }
 0x1af   :  { %4401 = vmatprep.mubr.msk.bf16.mxu1 %vm1051_vm4, %v5781_v59 }
 0x1b0   :  { %v1199_v56 = vpop.permute.xlu1 %1198 }
 0x1b1   :  { %v1245_v24 = vpop.permute.xlu0 %1244  ;;  %v1279_v27 = vsel %vm969_vm6, %v1119_v34, %v1199_v56  ;;  %v1100_v56 = vrot.slane %v6833_v30, 7  ;;  %v6834_v34 = vld [vmem:[#allocation45_spill] sm:$0xff] }
 0x1b2   :  { %v1315_v40 = vsel %vm1002_vm7, %v1277_v19, %v1245_v24  ;;  %v6055_v7 = vld [vmem:[#allocation2 + $0xd0] sm:$0xff] }
 0x1b3   :  { %1353 = vst.msk [vmem:[#allocation2 + $0xe0] sm:$0xff] %vm1051_vm4, %v1315_v40  ;;  %4473 = vmatprep.mubr.msk.bf16.mxu0 %vm1051_vm4, %v6055_v7 }
 0x1b4   :  { %v1247_v58 = vpop.permute.xlu1 %1246 }
 0x1b5   :  { %v1318_v8 = vsel %vm1002_vm7, %v1279_v27, %v1247_v58  ;;  %v1201_v49 = vpop.permute.xlu0 %1200  ;;  %v6064_v47 = vld [vmem:[#allocation2 + $0xd8] sm:$0xff]  ;;  %v1101_v27 = vrot.slane %v6834_v34, 7  ;;  %v1129_v58 = vsel %vm806_vm5, 0, %v1100_v56 }
 0x1b6   :  { %1354 = vst.msk [vmem:[#allocation2 + $0xe8] sm:$0xff] %vm1051_vm4, %v1318_v8  ;;  %4402 = vmatmul.mubr.msk.bf16.gmra.mrb[8].mxu1 %vm1051_vm4, %v5794_v35  ;;  %4474 = vmatmul.mubr.msk.bf16.gmra.mrb[72].mxu0 %vm1051_vm4, %v6064_v47  ;;  %v1281_v45 = vsel %vm969_vm6, %v1121_v39, %v1201_v49 }
 0x1b7   :  { %4405 = vmatprep.mubr.msk.bf16.mxu1 %vm1051_vm4, %v5813_v48  ;;  %v1131_v28 = vsel %vm806_vm5, 0, %v1101_v27 }
 0x1b8   :  { %v1203_v43 = vpop.permute.xlu1 %1202 }
 0x1b9   :  { %v1249_v32 = vpop.permute.xlu0 %1248  ;;  %v1283_v5 = vsel %vm969_vm6, %v1123_v6, %v1203_v43 }
 0x1ba   :  { %v1321_v54 = vsel %vm1002_vm7, %v1281_v45, %v1249_v32  ;;  %v6077_v0 = vld [vmem:[#allocation2 + $0xe0] sm:$0xff]  ;;  %v1102_v45 = vrot.slane %v5709_v20, 7 }
 0x1bb   :  { %1355 = vst.msk [vmem:[#allocation2 + $0xf0] sm:$0xff] %vm1051_vm4, %v1321_v54  ;;  %4477 = vmatprep.mubr.msk.bf16.mxu0 %vm1051_vm4, %v6077_v0 }
 0x1bc   :  { %v1251_v60 = vpop.permute.xlu1 %1250  ;;  %v1133_v20 = vsel %vm806_vm5, 0, %v1102_v45 }
 0x1bd   :  { %v1324_v18 = vsel %vm1002_vm7, %v1283_v5, %v1251_v60  ;;  %v1205_v29 = vpop.permute.xlu0 %1204  ;;  %v6086_v9 = vld [vmem:[#allocation2 + $0xe8] sm:$0xff]  ;;  %v1103_v5 = vrot.slane %v5705_v31, 7 }
 0x1be   :  { %1356 = vst.msk [vmem:[#allocation2 + $0xf8] sm:$0xff] %vm1051_vm4, %v1324_v18  ;;  %4406 = vmatmul.mubr.msk.bf16.gmra.mrb[12].mxu1 %vm1051_vm4, %v5825_v42  ;;  %4478 = vmatmul.mubr.msk.bf16.gmra.mrb[76].mxu0 %vm1051_vm4, %v6086_v9  ;;  %v1285_v52 = vsel %vm969_vm6, %v1125_v16, %v1205_v29 }
 0x1bf   :  { %4409 = vmatprep.mubr.msk.bf16.mxu1 %vm1051_vm4, %v5843_v63  ;;  %v1135_v15 = vsel %vm806_vm5, 0, %v1103_v5 }
 0x1c0   :  { %v1207_v62 = vpop.permute.xlu1 %1206 }
 0x1c1   :  { %v1253_v44 = vpop.permute.xlu0 %1252  ;;  %v1287_v17 = vsel %vm969_vm6, %v1127_v61, %v1207_v62  ;;  %v2996_v61 = vld [vmem:[%s6691_s5] sm:$0xf] }
 0x1c2   :  { %v1327_v46 = vsel %vm1002_vm7, %v1285_v52, %v1253_v44  ;;  %v6099_v12 = vld [vmem:[#allocation2 + $0xf0] sm:$0xff]  ;;  %v2122_v44 = vld [vmem:[#allocation2 + $0xa0] sm:$0xff]  ;;  %4770 = vmatprep.subr.msk.bf16.mxu1 %vm1466_vm2, %v2996_v61 }
 0x1c3   :  { %1357 = vst.msk [vmem:[#allocation2 + $0x100] sm:$0xff] %vm1051_vm4, %v1327_v46  ;;  %4481 = vmatprep.mubr.msk.bf16.mxu0 %vm1051_vm4, %v6099_v12 }
 0x1c4   :  { %v1255_v2 = vpop.permute.xlu1 %1254 }
 0x1c5   :  { %v1330_v19 = vsel %vm1002_vm7, %v1287_v17, %v1255_v2  ;;  %v1209_v24 = vpop.permute.xlu0 %1208  ;;  %v6108_v40 = vld [vmem:[#allocation2 + $0xf8] sm:$0xff]  ;;  %v2123_v17 = vld [vmem:[#allocation2 + $0xa8] sm:$0xff]  ;;  %v3099_v2 = vsel %vm1466_vm2, %v2996_v61, 0 }
 0x1c6   :  { %1358 = vst.msk [vmem:[#allocation2 + $0x108] sm:$0xff] %vm1051_vm4, %v1330_v19  ;;  %4410 = vmatmul.mubr.msk.bf16.gmra.mrb[16].mxu1 %vm1051_vm4, %v5855_v21  ;;  %4482 = vmatmul.mubr.msk.bf16.gmra.mrb[80].mxu0 %vm1051_vm4, %v6108_v40  ;;  %v1289_v33 = vsel %vm969_vm6, %v1129_v58, %v1209_v24 }
 0x1c7   :  { %4413 = vmatprep.mubr.msk.bf16.mxu1 %vm1051_vm4, %v5873_v57 }
 0x1c8   :  { %v1211_v1 = vpop.permute.xlu1 %1210 }
 0x1c9   :  { %v1257_v8 = vpop.permute.xlu0 %1256  ;;  %v1291_v39 = vsel %vm969_vm6, %v1131_v28, %v1211_v1 }
 0x1ca   :  { %v1333_v49 = vsel %vm1002_vm7, %v1289_v33, %v1257_v8  ;;  %v6121_v4 = vld [vmem:[#allocation2 + $0x100] sm:$0xff] }
 0x1cb   :  { %1359 = vst.msk [vmem:[#allocation2 + $0x110] sm:$0xff] %vm1051_vm4, %v1333_v49  ;;  %4485 = vmatprep.mubr.msk.bf16.mxu0 %vm1051_vm4, %v6121_v4 }
 0x1cc   :  { %v1259_v43 = vpop.permute.xlu1 %1258 }
 0x1cd   :  { %v1336_v32 = vsel %vm1002_vm7, %v1291_v39, %v1259_v43  ;;  %v1213_v54 = vpop.permute.xlu0 %1212  ;;  %v6130_v6 = vld [vmem:[#allocation2 + $0x108] sm:$0xff] }
 0x1ce   :  { %1360 = vst.msk [vmem:[#allocation2 + $0x118] sm:$0xff] %vm1051_vm4, %v1336_v32  ;;  %4414 = vmatmul.mubr.msk.bf16.gmra.mrb[20].mxu1 %vm1051_vm4, %v5885_v14  ;;  %4486 = vmatmul.mubr.msk.bf16.gmra.mrb[84].mxu0 %vm1051_vm4, %v6130_v6  ;;  %v1293_v37 = vsel %vm969_vm6, %v1133_v20, %v1213_v54 }
 0x1cf   :  { %4417 = vmatprep.mubr.msk.bf16.mxu1 %vm1051_vm4, %v5903_v13 }
 0x1d0   :  { %v1215_v60 = vpop.permute.xlu1 %1214 }
 0x1d1   :  { %v1261_v41 = vpop.permute.xlu0 %1260  ;;  %v1295_v23 = vsel %vm969_vm6, %v1135_v15, %v1215_v60 }
 0x1d2   :  { %v1339_v18 = vsel %vm1002_vm7, %v1293_v37, %v1261_v41  ;;  %v6143_v29 = vld [vmem:[#allocation2 + $0x110] sm:$0xff] }
 0x1d3   :  { %1361 = vst.msk [vmem:[#allocation2 + $0x120] sm:$0xff] %vm1051_vm4, %v1339_v18  ;;  %4489 = vmatprep.mubr.msk.bf16.mxu0 %vm1051_vm4, %v6143_v29 }
 0x1d4   :  { %v1263_v31 = vpop.permute.xlu1 %1262 }
 0x1d5   :  { %v1342_v16 = vsel %vm1002_vm7, %v1295_v23, %v1263_v31  ;;  %v6151_v62 = vld [vmem:[#allocation2 + $0x118] sm:$0xff] }
 0x1d6   :  { %1362 = vst.msk [vmem:[#allocation2 + $0x128] sm:$0xff] %vm1051_vm4, %v1342_v16  ;;  %4418 = vmatmul.mubr.msk.bf16.gmra.mrb[24].mxu1 %vm1051_vm4, %v5915_v55  ;;  %4490 = vmatmul.mubr.msk.bf16.gmra.mrb[88].mxu0 %vm1051_vm4, %v6151_v62 }
 0x1d7   :  { %4421 = vmatprep.mubr.msk.bf16.mxu1 %vm1051_vm4, %v5933_v51 }
 0x1da   :  { %v2153_v52 = vld [vmem:[#allocation2 + $0x120] sm:$0xff] }
 0x1db   :  { %4493 = vmatprep.mubr.msk.bf16.mxu0 %vm1051_vm4, %v2153_v52 }
 0x1dd   :  { %v2154_v46 = vld [vmem:[#allocation2 + $0x128] sm:$0xff] }
 0x1de   :  { %4422 = vmatmul.mubr.msk.bf16.gmra.mrb[28].mxu1 %vm1051_vm4, %v5945_v26  ;;  %4494 = vmatmul.mubr.msk.bf16.gmra.mrb[92].mxu0 %vm1051_vm4, %v2154_v46 }
 0x1df   :  { %4429 = vmatprep.mubr.msk.bf16.mxu1 %vm1051_vm4, %v5781_v59  ;;  %4501 = vmatprep.mubr.msk.bf16.mxu0 %vm1051_vm4, %v2122_v44  ;;  %v1868_v59 = vld [vmem:[#allocation2 + $0x98] sm:$0xff] }
 0x1e6   :  { %4430 = vmatmul.mubr.msk.bf16.vlgmr.msra.gmra.mrb[0].mxu1 %vm1051_vm4, %v5794_v35  ;;  %4502 = vmatmul.mubr.msk.bf16.vlgmr.msra.gmra.mrb[64].mxu0 %vm1051_vm4, %v2123_v17  ;;  %v2588_v35 = vld [vmem:[#allocation2 + $0x130] sm:$0xff] }
 0x1e7   :  { %4534 = vmatpush3.bf16.msra.mxu0 %v5777_v22  ;;  %4433 = vmatprep.mubr.msk.bf16.mxu1 %vm1051_vm4, %v5813_v48  ;;  %v1867_v22 = vld [vmem:[#allocation2 + $0x90] sm:$0xff]  ;;  %v2589_v48 = vld [vmem:[#allocation2 + $0x138] sm:$0xff] }
 0x1e8   :  { %4505 = vmatprep.mubr.msk.bf16.mxu0 %vm1051_vm4, %v5992_v36  ;;  %4769 = vmatprep.subr.msk.bf16.mxu0 %vm1466_vm2, %v6003_v11 }
 0x1e9   :  { %4570 = vmatpush3.bf16.msra.mxu1 %v3099_v2 }
 0x1eb   :  { %4536 = vmatpush3.bf16.msra.mxu0 %v6024_v25 }
 0x1ee   :  { %4434 = vmatmul.mubr.msk.bf16.gmra.mrb[4].mxu1 %vm1051_vm4, %v5825_v42  ;;  %4506 = vmatmul.mubr.msk.bf16.gmra.mrb[68].mxu0 %vm1051_vm4, %v6006_v50  ;;  %v6264_v42 = vld [vmem:[%s6692_s4] ss:$0 sm:$0xff] }
 0x1ef   :  { %4437 = vmatprep.mubr.msk.bf16.mxu1 %vm1051_vm4, %v5843_v63  ;;  %4509 = vmatprep.mubr.msk.bf16.mxu0 %vm1051_vm4, %v6030_v3 }
 0x1f6   :  { %4438 = vmatmul.mubr.msk.bf16.gmra.mrb[8].mxu1 %vm1051_vm4, %v5855_v21  ;;  %4510 = vmatmul.mubr.msk.bf16.gmra.mrb[72].mxu0 %vm1051_vm4, %v6041_v10 }
 0x1f7   :  { %4441 = vmatprep.mubr.msk.bf16.mxu1 %vm1051_vm4, %v5873_v57  ;;  %4513 = vmatprep.mubr.msk.bf16.mxu0 %vm1051_vm4, %v6055_v7 }
 0x1fe   :  { %4442 = vmatmul.mubr.msk.bf16.gmra.mrb[12].mxu1 %vm1051_vm4, %v5885_v14  ;;  %4514 = vmatmul.mubr.msk.bf16.gmra.mrb[76].mxu0 %vm1051_vm4, %v6064_v47 }
 0x1ff   :  { %4445 = vmatprep.mubr.msk.bf16.mxu1 %vm1051_vm4, %v5903_v13  ;;  %4517 = vmatprep.mubr.msk.bf16.mxu0 %vm1051_vm4, %v6077_v0 }
 0x206   :  { %4446 = vmatmul.mubr.msk.bf16.gmra.mrb[16].mxu1 %vm1051_vm4, %v5915_v55  ;;  %4518 = vmatmul.mubr.msk.bf16.gmra.mrb[80].mxu0 %vm1051_vm4, %v6086_v9 }
 0x207   :  { %4449 = vmatprep.mubr.msk.bf16.mxu1 %vm1051_vm4, %v5933_v51  ;;  %4521 = vmatprep.mubr.msk.bf16.mxu0 %vm1051_vm4, %v6099_v12 }
 0x20e   :  { %4450 = vmatmul.mubr.msk.bf16.gmra.mrb[20].mxu1 %vm1051_vm4, %v5945_v26  ;;  %4522 = vmatmul.mubr.msk.bf16.gmra.mrb[84].mxu0 %vm1051_vm4, %v6108_v40 }
 0x20f   :  { %4453 = vmatprep.mubr.msk.bf16.mxu1 %vm1051_vm4, %v5963_v53  ;;  %4525 = vmatprep.mubr.msk.bf16.mxu0 %vm1051_vm4, %v6121_v4 }
 0x216   :  { %4454 = vmatmul.mubr.msk.bf16.gmra.mrb[24].mxu1 %vm1051_vm4, %v5975_v38  ;;  %4526 = vmatmul.mubr.msk.bf16.gmra.mrb[88].mxu0 %vm1051_vm4, %v6130_v6 }
 0x217   :  { %4529 = vmatprep.mubr.msk.bf16.mxu0 %vm1051_vm4, %v6143_v29  ;;  %4457 = vmatprep.mubr.msk.bf16.mxu1 %vm1051_vm4, %v1867_v22 }
 0x21e   :  { %4458 = vmatmul.mubr.msk.bf16.gmra.mrb[28].mxu1 %vm1051_vm4, %v1868_v59  ;;  %4530 = vmatmul.mubr.msk.bf16.gmra.mrb[92].mxu0 %vm1051_vm4, %v6151_v62 }
 0x21f   :  { %4537 = vmatprep.mubr.msk.bf16.mxu0 %vm1051_vm4, %v6030_v3 }
 0x226   :  { %4538 = vmatmul.mubr.msk.bf16.vlgmr.msra.gmra.mrb[64].mxu0 %vm1051_vm4, %v6041_v10 }
 0x227   :  { %4541 = vmatprep.mubr.msk.bf16.mxu0 %vm1051_vm4, %v6055_v7 }
 0x22e   :  { %4542 = vmatmul.mubr.msk.bf16.gmra.mrb[68].mxu0 %vm1051_vm4, %v6064_v47 }
 0x22f   :  { %4545 = vmatprep.mubr.msk.bf16.mxu0 %vm1051_vm4, %v6077_v0 }
 0x236   :  { %4546 = vmatmul.mubr.msk.bf16.gmra.mrb[72].mxu0 %vm1051_vm4, %v6086_v9 }
 0x237   :  { %4549 = vmatprep.mubr.msk.bf16.mxu0 %vm1051_vm4, %v6099_v12 }
 0x23e   :  { %4550 = vmatmul.mubr.msk.bf16.gmra.mrb[76].mxu0 %vm1051_vm4, %v6108_v40 }
 0x23f   :  { %4553 = vmatprep.mubr.msk.bf16.mxu0 %vm1051_vm4, %v6121_v4 }
 0x246   :  { %4554 = vmatmul.mubr.msk.bf16.gmra.mrb[80].mxu0 %vm1051_vm4, %v6130_v6 }
 0x247   :  { %4557 = vmatprep.mubr.msk.bf16.mxu0 %vm1051_vm4, %v6143_v29 }
 0x24e   :  { %4558 = vmatmul.mubr.msk.bf16.gmra.mrb[84].mxu0 %vm1051_vm4, %v6151_v62 }
 0x24f   :  { %4561 = vmatprep.mubr.msk.bf16.mxu0 %vm1051_vm4, %v2153_v52 }
 0x256   :  { %4562 = vmatmul.mubr.msk.bf16.gmra.mrb[88].mxu0 %vm1051_vm4, %v2154_v46 }
 0x257   :  { %4565 = vmatprep.mubr.msk.bf16.mxu0 %vm1051_vm4, %v2588_v35 }
 0x25e   :  { %4566 = vmatmul.mubr.msk.bf16.gmra.mrb[92].mxu0 %vm1051_vm4, %v2589_v48 }
 0x2b9   :  { %v4431_v63 = vpop.f32.mrb[0].mxu1 }
 0x2ba   :  { %v2838_v21 = vadd.f32 %v4431_v63, %v6264_v42  ;;  %v1963_v57 = vpop.f32.mrb[1].mxu1 }
 0x2bb   :  { %v2836_v14 = vadd.f32 %v6264_v42, %v1963_v57  ;;  %v4432_v13 = vpop.f32.mrb[2].mxu1 }
 0x2bc   :  { %v2839_v55 = vadd.f32 %v4432_v13, %v6264_v42  ;;  %v1966_v51 = vpop.f32.mrb[3].mxu1  ;;  %v2902_v53 = vmax.f32 %v2838_v21, 0.0 }
 0x2bd   :  { %v2837_v26 = vadd.f32 %v6264_v42, %v1966_v51  ;;  %v2900_v36 = vmax.f32 %v2836_v14, 0.0 }
 0x2be   :  { %v2903_v38 = vmax.f32 %v2839_v55, 0.0 }
 0x2bf   :  { %v2901_v11 = vmax.f32 %v2837_v26, 0.0 }
 0x2c0   :  { %v2965_v50 = vpack.c.bf16 %v2903_v38, %v2902_v53 }
 0x2c1   :  { %v2964_v25 = vpack.c.bf16 %v2901_v11, %v2900_v36  ;;  %v4435_v3 = vpop.f32.mrb[4].mxu1 }
 0x2c2   :  { %v2842_v10 = vadd.f32 %v4435_v3, %v6264_v42  ;;  %v1979_v7 = vpop.f32.mrb[5].mxu1 }
 0x2c3   :  { %v2840_v47 = vadd.f32 %v6264_v42, %v1979_v7  ;;  %v4436_v0 = vpop.f32.mrb[6].mxu1  ;;  %4571 = vmatprep.mubr.msk.bf16.mxu1 %vm969_vm6, %v2964_v25 }
 0x2c4   :  { %v2843_v9 = vadd.f32 %v4436_v0, %v6264_v42  ;;  %v1982_v12 = vpop.f32.mrb[7].mxu1  ;;  %4572 = vmatmul.mubr.msk.bf16.vlgmr.msra.gmra.mrb[32].mxu1 %vm969_vm6, %v2965_v50  ;;  %v2906_v56 = vmax.f32 %v2842_v10, 0.0 }
 0x2c5   :  { %v2841_v30 = vadd.f32 %v6264_v42, %v1982_v12  ;;  %v2904_v24 = vmax.f32 %v2840_v47, 0.0 }
 0x2c6   :  { %v2907_v19 = vmax.f32 %v2843_v9, 0.0 }
 0x2c7   :  { %v2905_v40 = vmax.f32 %v2841_v30, 0.0 }
 0x2c8   :  { %v2967_v34 = vpack.c.bf16 %v2907_v19, %v2906_v56 }
 0x2c9   :  { %v2966_v27 = vpack.c.bf16 %v2905_v40, %v2904_v24  ;;  %v4439_v58 = vpop.f32.mrb[8].mxu1 }
 0x2ca   :  { %v2846_v1 = vadd.f32 %v4439_v58, %v6264_v42  ;;  %v1995_v33 = vpop.f32.mrb[9].mxu1 }
 0x2cb   :  { %v2844_v8 = vadd.f32 %v6264_v42, %v1995_v33  ;;  %v4440_v49 = vpop.f32.mrb[10].mxu1  ;;  %4575 = vmatprep.mubr.msk.bf16.mxu1 %vm969_vm6, %v2966_v27 }
 0x2cc   :  { %v2847_v4 = vadd.f32 %v4440_v49, %v6264_v42  ;;  %v1998_v28 = vpop.f32.mrb[11].mxu1  ;;  %4576 = vmatmul.mubr.msk.bf16.gmra.mrb[36].mxu1 %vm969_vm6, %v2967_v34  ;;  %v2910_v43 = vmax.f32 %v2846_v1, 0.0 }
 0x2cd   :  { %v2845_v39 = vadd.f32 %v6264_v42, %v1998_v28  ;;  %v2908_v32 = vmax.f32 %v2844_v8, 0.0 }
 0x2ce   :  { %v2911_v45 = vmax.f32 %v2847_v4, 0.0 }
 0x2cf   :  { %v2909_v54 = vmax.f32 %v2845_v39, 0.0 }
 0x2d0   :  { %v2969_v6 = vpack.c.bf16 %v2911_v45, %v2910_v43 }
 0x2d1   :  { %v2968_v5 = vpack.c.bf16 %v2909_v54, %v2908_v32  ;;  %v4443_v20 = vpop.f32.mrb[12].mxu1 }
 0x2d2   :  { %v2850_v60 = vadd.f32 %v4443_v20, %v6264_v42  ;;  %v2011_v37 = vpop.f32.mrb[13].mxu1 }
 0x2d3   :  { %v2848_v41 = vadd.f32 %v6264_v42, %v2011_v37  ;;  %v4444_v18 = vpop.f32.mrb[14].mxu1  ;;  %4579 = vmatprep.mubr.msk.bf16.mxu1 %vm969_vm6, %v2968_v5 }
 0x2d4   :  { %v2851_v29 = vadd.f32 %v4444_v18, %v6264_v42  ;;  %v2014_v15 = vpop.f32.mrb[15].mxu1  ;;  %4580 = vmatmul.mubr.msk.bf16.gmra.mrb[40].mxu1 %vm969_vm6, %v2969_v6  ;;  %v2914_v31 = vmax.f32 %v2850_v60, 0.0 }
 0x2d5   :  { %v2849_v23 = vadd.f32 %v6264_v42, %v2014_v15  ;;  %v2912_v62 = vmax.f32 %v2848_v41, 0.0 }
 0x2d6   :  { %v2915_v16 = vmax.f32 %v2851_v29, 0.0 }
 0x2d7   :  { %v2913_v52 = vmax.f32 %v2849_v23, 0.0 }
 0x2d8   :  { %v2971_v44 = vpack.c.bf16 %v2915_v16, %v2914_v31 }
 0x2d9   :  { %v2970_v46 = vpack.c.bf16 %v2913_v52, %v2912_v62  ;;  %v4447_v61 = vpop.f32.mrb[16].mxu1 }
 0x2da   :  { %v2854_v17 = vadd.f32 %v4447_v61, %v6264_v42  ;;  %v2027_v2 = vpop.f32.mrb[17].mxu1 }
 0x2db   :  { %v2852_v22 = vadd.f32 %v6264_v42, %v2027_v2  ;;  %v4448_v59 = vpop.f32.mrb[18].mxu1  ;;  %4583 = vmatprep.mubr.msk.bf16.mxu1 %vm969_vm6, %v2970_v46 }
 0x2dc   :  { %v2855_v35 = vadd.f32 %v4448_v59, %v6264_v42  ;;  %v2030_v48 = vpop.f32.mrb[19].mxu1  ;;  %4584 = vmatmul.mubr.msk.bf16.gmra.mrb[44].mxu1 %vm969_vm6, %v2971_v44  ;;  %v2918_v21 = vmax.f32 %v2854_v17, 0.0 }
 0x2dd   :  { %v2853_v63 = vadd.f32 %v6264_v42, %v2030_v48  ;;  %v2916_v14 = vmax.f32 %v2852_v22, 0.0 }
 0x2de   :  { %v2919_v57 = vmax.f32 %v2855_v35, 0.0 }
 0x2df   :  { %v2917_v13 = vmax.f32 %v2853_v63, 0.0 }
 0x2e0   :  { %v2973_v55 = vpack.c.bf16 %v2919_v57, %v2918_v21 }
 0x2e1   :  { %v2972_v51 = vpack.c.bf16 %v2917_v13, %v2916_v14  ;;  %v4451_v26 = vpop.f32.mrb[20].mxu1 }
 0x2e2   :  { %v2858_v53 = vadd.f32 %v4451_v26, %v6264_v42  ;;  %v2043_v38 = vpop.f32.mrb[21].mxu1 }
 0x2e3   :  { %v2856_v36 = vadd.f32 %v6264_v42, %v2043_v38  ;;  %v4452_v11 = vpop.f32.mrb[22].mxu1  ;;  %4587 = vmatprep.mubr.msk.bf16.mxu1 %vm969_vm6, %v2972_v51 }
 0x2e4   :  { %v2859_v50 = vadd.f32 %v4452_v11, %v6264_v42  ;;  %v2046_v25 = vpop.f32.mrb[23].mxu1  ;;  %4588 = vmatmul.mubr.msk.bf16.gmra.mrb[48].mxu1 %vm969_vm6, %v2973_v55  ;;  %v2922_v10 = vmax.f32 %v2858_v53, 0.0 }
 0x2e5   :  { %v2857_v3 = vadd.f32 %v6264_v42, %v2046_v25  ;;  %v2920_v47 = vmax.f32 %v2856_v36, 0.0 }
 0x2e6   :  { %v2923_v7 = vmax.f32 %v2859_v50, 0.0 }
 0x2e7   :  { %v2921_v0 = vmax.f32 %v2857_v3, 0.0 }
 0x2e8   :  { %v2975_v9 = vpack.c.bf16 %v2923_v7, %v2922_v10 }
 0x2e9   :  { %v2974_v12 = vpack.c.bf16 %v2921_v0, %v2920_v47  ;;  %v4455_v30 = vpop.f32.mrb[24].mxu1 }
 0x2ea   :  { %v2862_v56 = vadd.f32 %v4455_v30, %v6264_v42  ;;  %v2059_v19 = vpop.f32.mrb[25].mxu1 }
 0x2eb   :  { %v2860_v24 = vadd.f32 %v6264_v42, %v2059_v19  ;;  %v4456_v40 = vpop.f32.mrb[26].mxu1  ;;  %4591 = vmatprep.mubr.msk.bf16.mxu1 %vm969_vm6, %v2974_v12 }
 0x2ec   :  { %v2863_v34 = vadd.f32 %v4456_v40, %v6264_v42  ;;  %v2062_v27 = vpop.f32.mrb[27].mxu1  ;;  %4592 = vmatmul.mubr.msk.bf16.gmra.mrb[52].mxu1 %vm969_vm6, %v2975_v9  ;;  %v2926_v1 = vmax.f32 %v2862_v56, 0.0 }
 0x2ed   :  { %v2861_v58 = vadd.f32 %v6264_v42, %v2062_v27  ;;  %v2924_v8 = vmax.f32 %v2860_v24, 0.0 }
 0x2ee   :  { %v2927_v33 = vmax.f32 %v2863_v34, 0.0 }
 0x2ef   :  { %v2925_v49 = vmax.f32 %v2861_v58, 0.0 }
 0x2f0   :  { %v2977_v4 = vpack.c.bf16 %v2927_v33, %v2926_v1 }
 0x2f1   :  { %v2976_v28 = vpack.c.bf16 %v2925_v49, %v2924_v8  ;;  %v4459_v39 = vpop.f32.mrb[28].mxu1 }
 0x2f2   :  { %v2866_v43 = vadd.f32 %v4459_v39, %v6264_v42  ;;  %v2075_v45 = vpop.f32.mrb[29].mxu1 }
 0x2f3   :  { %v2864_v32 = vadd.f32 %v6264_v42, %v2075_v45  ;;  %v4460_v54 = vpop.f32.mrb[30].mxu1  ;;  %4595 = vmatprep.mubr.msk.bf16.mxu1 %vm969_vm6, %v2976_v28 }
 0x2f4   :  { %v2867_v6 = vadd.f32 %v4460_v54, %v6264_v42  ;;  %v2078_v5 = vpop.f32.mrb[31].mxu1  ;;  %4596 = vmatmul.mubr.msk.bf16.gmra.mrb[56].mxu1 %vm969_vm6, %v2977_v4  ;;  %v2930_v60 = vmax.f32 %v2866_v43, 0.0 }
 0x2f5   :  { %v2865_v20 = vadd.f32 %v6264_v42, %v2078_v5  ;;  %v2928_v41 = vmax.f32 %v2864_v32, 0.0 }
 0x2f6   :  { %v2931_v37 = vmax.f32 %v2867_v6, 0.0 }
 0x2f7   :  { %v2929_v18 = vmax.f32 %v2865_v20, 0.0 }
 0x2f8   :  { %v2979_v29 = vpack.c.bf16 %v2931_v37, %v2930_v60 }
 0x2f9   :  { %v2978_v15 = vpack.c.bf16 %v2929_v18, %v2928_v41  ;;  %v4539_v23 = vpop.f32.mrb[64].mxu0 }
 0x2fa   :  { %v2870_v31 = vadd.f32 %v4539_v23, %v6264_v42  ;;  %v2672_v16 = vpop.f32.mrb[65].mxu0 }
 0x2fb   :  { %v2868_v62 = vadd.f32 %v6264_v42, %v2672_v16  ;;  %v4540_v52 = vpop.f32.mrb[66].mxu0  ;;  %4599 = vmatprep.mubr.msk.bf16.mxu1 %vm969_vm6, %v2978_v15 }
 0x2fc   :  { %v2871_v44 = vadd.f32 %v4540_v52, %v6264_v42  ;;  %v2675_v46 = vpop.f32.mrb[67].mxu0  ;;  %4600 = vmatmul.mubr.msk.bf16.gmra.mrb[60].mxu1 %vm969_vm6, %v2979_v29  ;;  %v2934_v17 = vmax.f32 %v2870_v31, 0.0 }
 0x2fd   :  { %v2869_v61 = vadd.f32 %v6264_v42, %v2675_v46  ;;  %v2932_v22 = vmax.f32 %v2868_v62, 0.0 }
 0x2fe   :  { %v2935_v2 = vmax.f32 %v2871_v44, 0.0 }
 0x2ff   :  { %v2933_v59 = vmax.f32 %v2869_v61, 0.0 }
 0x300   :  { %v2981_v35 = vpack.c.bf16 %v2935_v2, %v2934_v17 }
 0x301   :  { %v2980_v48 = vpack.c.bf16 %v2933_v59, %v2932_v22  ;;  %v4543_v63 = vpop.f32.mrb[68].mxu0 }
 0x302   :  { %v2874_v21 = vadd.f32 %v4543_v63, %v6264_v42  ;;  %v2688_v57 = vpop.f32.mrb[69].mxu0 }
 0x303   :  { %v2872_v14 = vadd.f32 %v6264_v42, %v2688_v57  ;;  %v4544_v13 = vpop.f32.mrb[70].mxu0  ;;  %4603 = vmatprep.mubr.msk.bf16.mxu1 %vm969_vm6, %v2980_v48 }
 0x304   :  { %v2875_v55 = vadd.f32 %v4544_v13, %v6264_v42  ;;  %v2691_v51 = vpop.f32.mrb[71].mxu0  ;;  %4604 = vmatmul.mubr.msk.bf16.gmra.mrb[64].mxu1 %vm969_vm6, %v2981_v35  ;;  %v2938_v53 = vmax.f32 %v2874_v21, 0.0 }
 0x305   :  { %v2873_v26 = vadd.f32 %v6264_v42, %v2691_v51  ;;  %v2936_v36 = vmax.f32 %v2872_v14, 0.0 }
 0x306   :  { %v2939_v38 = vmax.f32 %v2875_v55, 0.0 }
 0x307   :  { %v2937_v11 = vmax.f32 %v2873_v26, 0.0 }
 0x308   :  { %v2983_v50 = vpack.c.bf16 %v2939_v38, %v2938_v53 }
 0x309   :  { %v2982_v25 = vpack.c.bf16 %v2937_v11, %v2936_v36  ;;  %v4547_v3 = vpop.f32.mrb[72].mxu0 }
 0x30a   :  { %v2878_v10 = vadd.f32 %v4547_v3, %v6264_v42  ;;  %v2704_v7 = vpop.f32.mrb[73].mxu0 }
 0x30b   :  { %v2876_v47 = vadd.f32 %v6264_v42, %v2704_v7  ;;  %v4548_v0 = vpop.f32.mrb[74].mxu0  ;;  %4607 = vmatprep.mubr.msk.bf16.mxu1 %vm969_vm6, %v2982_v25 }
 0x30c   :  { %v2879_v9 = vadd.f32 %v4548_v0, %v6264_v42  ;;  %v2707_v12 = vpop.f32.mrb[75].mxu0  ;;  %4608 = vmatmul.mubr.msk.bf16.gmra.mrb[68].mxu1 %vm969_vm6, %v2983_v50  ;;  %v2942_v56 = vmax.f32 %v2878_v10, 0.0 }
 0x30d   :  { %v2877_v30 = vadd.f32 %v6264_v42, %v2707_v12  ;;  %v2940_v24 = vmax.f32 %v2876_v47, 0.0 }
 0x30e   :  { %v2943_v19 = vmax.f32 %v2879_v9, 0.0 }
 0x30f   :  { %v2941_v40 = vmax.f32 %v2877_v30, 0.0 }
 0x310   :  { %v2985_v34 = vpack.c.bf16 %v2943_v19, %v2942_v56 }
 0x311   :  { %v2984_v27 = vpack.c.bf16 %v2941_v40, %v2940_v24  ;;  %v4551_v58 = vpop.f32.mrb[76].mxu0 }
 0x312   :  { %v2882_v1 = vadd.f32 %v4551_v58, %v6264_v42  ;;  %v2720_v33 = vpop.f32.mrb[77].mxu0 }
 0x313   :  { %v2880_v8 = vadd.f32 %v6264_v42, %v2720_v33  ;;  %v4552_v49 = vpop.f32.mrb[78].mxu0  ;;  %4611 = vmatprep.mubr.msk.bf16.mxu1 %vm969_vm6, %v2984_v27 }
 0x314   :  { %v2883_v4 = vadd.f32 %v4552_v49, %v6264_v42  ;;  %v2723_v28 = vpop.f32.mrb[79].mxu0  ;;  %4612 = vmatmul.mubr.msk.bf16.gmra.mrb[72].mxu1 %vm969_vm6, %v2985_v34  ;;  %v2946_v43 = vmax.f32 %v2882_v1, 0.0 }
 0x315   :  { %v2881_v39 = vadd.f32 %v6264_v42, %v2723_v28  ;;  %v2944_v32 = vmax.f32 %v2880_v8, 0.0 }
 0x316   :  { %v2947_v45 = vmax.f32 %v2883_v4, 0.0 }
 0x317   :  { %v2945_v54 = vmax.f32 %v2881_v39, 0.0  ;;  %v4782_v39 = vpop.permute.xlu1 %4781 }
 0x318   :  { %v2987_v6 = vpack.c.bf16 %v2947_v45, %v2946_v43  ;;  %v6365_v43 = vld [vmem:[%s6692_s4 + $0x1] ss:$0 sm:$0xff]  ;;  %v4777_v45 = vpop.permute.xlu0 %4776 }
 0x319   :  { %v2986_v5 = vpack.c.bf16 %v2945_v54, %v2944_v32  ;;  %v4555_v20 = vpop.f32.mrb[80].mxu0 }
 0x31a   :  { %v2886_v60 = vadd.f32 %v4555_v20, %v6264_v42  ;;  %v2736_v37 = vpop.f32.mrb[81].mxu0 }
 0x31b   :  { %v2884_v41 = vadd.f32 %v6264_v42, %v2736_v37  ;;  %v4556_v18 = vpop.f32.mrb[82].mxu0  ;;  %4615 = vmatprep.mubr.msk.bf16.mxu1 %vm969_vm6, %v2986_v5 }
 0x31c   :  { %v2887_v29 = vadd.f32 %v4556_v18, %v6264_v42  ;;  %v2739_v15 = vpop.f32.mrb[83].mxu0  ;;  %4616 = vmatmul.mubr.msk.bf16.gmra.mrb[76].mxu1 %vm969_vm6, %v2987_v6  ;;  %v2950_v31 = vmax.f32 %v2886_v60, 0.0 }
 0x31d   :  { %v2885_v23 = vadd.f32 %v6264_v42, %v2739_v15  ;;  %v2948_v62 = vmax.f32 %v2884_v41, 0.0 }
 0x31e   :  { %v2951_v16 = vmax.f32 %v2887_v29, 0.0 }
 0x31f   :  { %v2949_v52 = vmax.f32 %v2885_v23, 0.0  ;;  %v4792_v23 = vpop.permute.xlu1 %4791 }
 0x320   :  { %v2989_v44 = vpack.c.bf16 %v2951_v16, %v2950_v31 }
 0x321   :  { %v2988_v46 = vpack.c.bf16 %v2949_v52, %v2948_v62  ;;  %v4559_v61 = vpop.f32.mrb[84].mxu0  ;;  %v4787_v62 = vpop.permute.xlu0 %4786 }
 0x322   :  { %v2890_v17 = vadd.f32 %v4559_v61, %v6264_v42  ;;  %v2752_v2 = vpop.f32.mrb[85].mxu0 }
 0x323   :  { %v2888_v22 = vadd.f32 %v6264_v42, %v2752_v2  ;;  %v4560_v59 = vpop.f32.mrb[86].mxu0  ;;  %4619 = vmatprep.mubr.msk.bf16.mxu1 %vm969_vm6, %v2988_v46 }
 0x324   :  { %v2891_v35 = vadd.f32 %v4560_v59, %v6264_v42  ;;  %v2755_v48 = vpop.f32.mrb[87].mxu0  ;;  %4620 = vmatmul.mubr.msk.bf16.gmra.mrb[80].mxu1 %vm969_vm6, %v2989_v44  ;;  %v2954_v21 = vmax.f32 %v2890_v17, 0.0 }
 0x325   :  { %v2889_v63 = vadd.f32 %v6264_v42, %v2755_v48  ;;  %v2952_v14 = vmax.f32 %v2888_v22, 0.0 }
 0x326   :  { %v2955_v57 = vmax.f32 %v2891_v35, 0.0 }
 0x327   :  { %v2953_v13 = vmax.f32 %v2889_v63, 0.0 }
 0x328   :  { %v2991_v55 = vpack.c.bf16 %v2955_v57, %v2954_v21 }
 0x329   :  { %v2990_v51 = vpack.c.bf16 %v2953_v13, %v2952_v14  ;;  %v4563_v26 = vpop.f32.mrb[88].mxu0  ;;  %v4802_v13 = vpop.permute.xlu1 %4801 }
 0x32a   :  { %v2894_v53 = vadd.f32 %v4563_v26, %v6264_v42  ;;  %v2768_v38 = vpop.f32.mrb[89].mxu0  ;;  %v4797_v26 = vpop.permute.xlu0 %4796 }
 0x32b   :  { %v2892_v36 = vadd.f32 %v6264_v42, %v2768_v38  ;;  %v4564_v11 = vpop.f32.mrb[90].mxu0  ;;  %4623 = vmatprep.mubr.msk.bf16.mxu1 %vm969_vm6, %v2990_v51 }
 0x32c   :  { %v2895_v50 = vadd.f32 %v4564_v11, %v6264_v42  ;;  %v2771_v25 = vpop.f32.mrb[91].mxu0  ;;  %4624 = vmatmul.mubr.msk.bf16.gmra.mrb[84].mxu1 %vm969_vm6, %v2991_v55  ;;  %v2958_v10 = vmax.f32 %v2894_v53, 0.0 }
 0x32d   :  { %v2893_v3 = vadd.f32 %v6264_v42, %v2771_v25  ;;  %v2956_v47 = vmax.f32 %v2892_v36, 0.0 }
 0x32e   :  { %v2959_v7 = vmax.f32 %v2895_v50, 0.0 }
 0x32f   :  { %v2957_v0 = vmax.f32 %v2893_v3, 0.0 }
 0x330   :  { %v2993_v9 = vpack.c.bf16 %v2959_v7, %v2958_v10 }
 0x331   :  { %v2992_v12 = vpack.c.bf16 %v2957_v0, %v2956_v47  ;;  %v4567_v30 = vpop.f32.mrb[92].mxu0 }
 0x332   :  { %v2898_v56 = vadd.f32 %v4567_v30, %v6264_v42  ;;  %v2784_v19 = vpop.f32.mrb[93].mxu0 }
 0x333   :  { %v2896_v24 = vadd.f32 %v6264_v42, %v2784_v19  ;;  %v4568_v40 = vpop.f32.mrb[94].mxu0  ;;  %4627 = vmatprep.mubr.msk.bf16.mxu1 %vm969_vm6, %v2992_v12 }
 0x334   :  { %v2899_v34 = vadd.f32 %v4568_v40, %v6264_v42  ;;  %v2787_v27 = vpop.f32.mrb[95].mxu0  ;;  %4628 = vmatmul.mubr.msk.bf16.gmra.mrb[88].mxu1 %vm969_vm6, %v2993_v9  ;;  %v2962_v1 = vmax.f32 %v2898_v56, 0.0  ;;  %v4812_v56 = vpop.permute.xlu1 %4811 }
 0x335   :  { %v2897_v58 = vadd.f32 %v6264_v42, %v2787_v27  ;;  %v2960_v8 = vmax.f32 %v2896_v24, 0.0  ;;  %v4807_v40 = vpop.permute.xlu0 %4806 }
 0x336   :  { %v2963_v33 = vmax.f32 %v2899_v34, 0.0 }
 0x337   :  { %v2961_v49 = vmax.f32 %v2897_v58, 0.0 }
 0x338   :  { %v2995_v4 = vpack.c.bf16 %v2963_v33, %v2962_v1 }
 0x339   :  { %v2994_v28 = vpack.c.bf16 %v2961_v49, %v2960_v8 }
 0x33b   :  { %4631 = vmatprep.mubr.msk.bf16.mxu1 %vm969_vm6, %v2994_v28 }
 0x33c   :  { %4632 = vmatmul.mubr.msk.bf16.gmra.mrb[92].mxu1 %vm969_vm6, %v2995_v4 }
 0x397   :  { %v4573_v32 = vpop.f32.mrb[32].mxu1 }
 0x398   :  { %v3144_v42 = vadd.f32 %v4573_v32, %v6365_v43  ;;  %v3135_v54 = vpop.f32.mrb[33].mxu1 }
 0x399   :  { %v3136_v6 = vadd.f32 %v6365_v43, %v3135_v54  ;;  %v4574_v5 = vpop.f32.mrb[34].mxu1 }
 0x39a   :  { %v4974_v20 = vadd.low.f32.bf16 %v3144_v42, %v4782_v39  ;;  %v3147_v60 = vadd.f32 %v4574_v5, %v6365_v43  ;;  %v3138_v37 = vpop.f32.mrb[35].mxu1 }
 0x39b   :  { %v4975_v41 = vadd.low.f32.bf16 %v3136_v6, %v4777_v45  ;;  %v3139_v18 = vadd.f32 %v6365_v43, %v3138_v37  ;;  %v4822_v6 = vpop.permute.xlu1 %4821 }
 0x39c   :  { %v3776_v29 = vmax.f32 %v4974_v20, 0.0  ;;  %v4976_v15 = vadd.high.f32.bf16 %v3147_v60, %v4782_v39  ;;  %v4817_v60 = vpop.permute.xlu0 %4816 }
 0x39d   :  { %v3774_v31 = vmax.f32 %v4975_v41, 0.0  ;;  %v4977_v16 = vadd.high.f32.bf16 %v3139_v18, %v4777_v45 }
 0x39e   :  { %3840 = vst.msk [vmem:[%s6693_s6 + $0x10] sm:$0xff] %vm969_vm6, %v3776_v29  ;;  %v3777_v52 = vmax.f32 %v4976_v15, 0.0 }
 0x39f   :  { %3838 = vst.msk [vmem:[%s6693_s6] sm:$0xff] %vm969_vm6, %v3774_v31  ;;  %v3775_v44 = vmax.f32 %v4977_v16, 0.0  ;;  %v4577_v46 = vpop.f32.mrb[36].mxu1 }
 0x3a0   :  { %3841 = vst.msk [vmem:[%s6693_s6 + $0x18] sm:$0xff] %vm969_vm6, %v3777_v52  ;;  %v3160_v61 = vadd.f32 %v4577_v46, %v6365_v43  ;;  %v3151_v17 = vpop.f32.mrb[37].mxu1 }
 0x3a1   :  { %3839 = vst.msk [vmem:[%s6693_s6 + $0x8] sm:$0xff] %vm969_vm6, %v3775_v44  ;;  %v3152_v2 = vadd.f32 %v6365_v43, %v3151_v17  ;;  %v4578_v22 = vpop.f32.mrb[38].mxu1 }
 0x3a2   :  { %v4978_v59 = vadd.low.f32.bf16 %v3160_v61, %v4792_v23  ;;  %v3163_v35 = vadd.f32 %v4578_v22, %v6365_v43  ;;  %v3154_v48 = vpop.f32.mrb[39].mxu1 }
 0x3a3   :  { %v4979_v63 = vadd.low.f32.bf16 %v3152_v2, %v4787_v62  ;;  %v3155_v21 = vadd.f32 %v6365_v43, %v3154_v48  ;;  %v4832_v2 = vpop.permute.xlu1 %4831 }
 0x3a4   :  { %v3780_v57 = vmax.f32 %v4978_v59, 0.0  ;;  %v4980_v14 = vadd.high.f32.bf16 %v3163_v35, %v4792_v23  ;;  %v4827_v35 = vpop.permute.xlu0 %4826 }
 0x3a5   :  { %v3778_v55 = vmax.f32 %v4979_v63, 0.0  ;;  %v4981_v51 = vadd.high.f32.bf16 %v3155_v21, %v4787_v62 }
 0x3a6   :  { %3844 = vst.msk [vmem:[%s6693_s6 + $0x30] sm:$0xff] %vm969_vm6, %v3780_v57  ;;  %v3781_v53 = vmax.f32 %v4980_v14, 0.0 }
 0x3a7   :  { %3842 = vst.msk [vmem:[%s6693_s6 + $0x20] sm:$0xff] %vm969_vm6, %v3778_v55  ;;  %v3779_v38 = vmax.f32 %v4981_v51, 0.0  ;;  %v4581_v36 = vpop.f32.mrb[40].mxu1 }
 0x3a8   :  { %3845 = vst.msk [vmem:[%s6693_s6 + $0x38] sm:$0xff] %vm969_vm6, %v3781_v53  ;;  %v3176_v11 = vadd.f32 %v4581_v36, %v6365_v43  ;;  %v3167_v50 = vpop.f32.mrb[41].mxu1 }
 0x3a9   :  { %3843 = vst.msk [vmem:[%s6693_s6 + $0x28] sm:$0xff] %vm969_vm6, %v3779_v38  ;;  %v3168_v25 = vadd.f32 %v6365_v43, %v3167_v50  ;;  %v4582_v3 = vpop.f32.mrb[42].mxu1 }
 0x3aa   :  { %v4982_v10 = vadd.low.f32.bf16 %v3176_v11, %v4802_v13  ;;  %v3179_v7 = vadd.f32 %v4582_v3, %v6365_v43  ;;  %v3170_v47 = vpop.f32.mrb[43].mxu1 }
 0x3ab   :  { %v4983_v0 = vadd.low.f32.bf16 %v3168_v25, %v4797_v26  ;;  %v3171_v9 = vadd.f32 %v6365_v43, %v3170_v47  ;;  %v4842_v25 = vpop.permute.xlu1 %4841 }
 0x3ac   :  { %v3784_v12 = vmax.f32 %v4982_v10, 0.0  ;;  %v4984_v30 = vadd.high.f32.bf16 %v3179_v7, %v4802_v13  ;;  %v4837_v7 = vpop.permute.xlu0 %4836 }
 0x3ad   :  { %v3782_v19 = vmax.f32 %v4983_v0, 0.0  ;;  %v4985_v24 = vadd.high.f32.bf16 %v3171_v9, %v4797_v26 }
 0x3ae   :  { %3848 = vst.msk [vmem:[%s6693_s6 + $0x50] sm:$0xff] %vm969_vm6, %v3784_v12  ;;  %v3785_v34 = vmax.f32 %v4984_v30, 0.0 }
 0x3af   :  { %3846 = vst.msk [vmem:[%s6693_s6 + $0x40] sm:$0xff] %vm969_vm6, %v3782_v19  ;;  %v3783_v27 = vmax.f32 %v4985_v24, 0.0  ;;  %v4585_v58 = vpop.f32.mrb[44].mxu1 }
 0x3b0   :  { %3849 = vst.msk [vmem:[%s6693_s6 + $0x58] sm:$0xff] %vm969_vm6, %v3785_v34  ;;  %v3192_v1 = vadd.f32 %v4585_v58, %v6365_v43  ;;  %v3183_v33 = vpop.f32.mrb[45].mxu1 }
 0x3b1   :  { %3847 = vst.msk [vmem:[%s6693_s6 + $0x48] sm:$0xff] %vm969_vm6, %v3783_v27  ;;  %v3184_v8 = vadd.f32 %v6365_v43, %v3183_v33  ;;  %v4586_v49 = vpop.f32.mrb[46].mxu1 }
 0x3b2   :  { %v4986_v4 = vadd.low.f32.bf16 %v3192_v1, %v4812_v56  ;;  %v3195_v28 = vadd.f32 %v4586_v49, %v6365_v43  ;;  %v3186_v39 = vpop.f32.mrb[47].mxu1 }
 0x3b3   :  { %v4987_v45 = vadd.low.f32.bf16 %v3184_v8, %v4807_v40  ;;  %v3187_v32 = vadd.f32 %v6365_v43, %v3186_v39  ;;  %v4852_v8 = vpop.permute.xlu1 %4851 }
 0x3b4   :  { %v3788_v42 = vmax.f32 %v4986_v4, 0.0  ;;  %v4988_v54 = vadd.high.f32.bf16 %v3195_v28, %v4812_v56  ;;  %v4847_v28 = vpop.permute.xlu0 %4846 }
 0x3b5   :  { %v3786_v5 = vmax.f32 %v4987_v45, 0.0  ;;  %v4989_v20 = vadd.high.f32.bf16 %v3187_v32, %v4807_v40 }
 0x3b6   :  { %3852 = vst.msk [vmem:[%s6693_s6 + $0x70] sm:$0xff] %vm969_vm6, %v3788_v42  ;;  %v3789_v37 = vmax.f32 %v4988_v54, 0.0 }
 0x3b7   :  { %3850 = vst.msk [vmem:[%s6693_s6 + $0x60] sm:$0xff] %vm969_vm6, %v3786_v5  ;;  %v3787_v41 = vmax.f32 %v4989_v20, 0.0  ;;  %v4589_v18 = vpop.f32.mrb[48].mxu1 }
 0x3b8   :  { %3853 = vst.msk [vmem:[%s6693_s6 + $0x78] sm:$0xff] %vm969_vm6, %v3789_v37  ;;  %v3208_v29 = vadd.f32 %v4589_v18, %v6365_v43  ;;  %v3199_v15 = vpop.f32.mrb[49].mxu1 }
 0x3b9   :  { %3851 = vst.msk [vmem:[%s6693_s6 + $0x68] sm:$0xff] %vm969_vm6, %v3787_v41  ;;  %v3200_v23 = vadd.f32 %v6365_v43, %v3199_v15  ;;  %v4590_v31 = vpop.f32.mrb[50].mxu1 }
 0x3ba   :  { %v4990_v16 = vadd.low.f32.bf16 %v3208_v29, %v4822_v6  ;;  %v3211_v62 = vadd.f32 %v4590_v31, %v6365_v43  ;;  %v3202_v52 = vpop.f32.mrb[51].mxu1 }
 0x3bb   :  { %v4991_v44 = vadd.low.f32.bf16 %v3200_v23, %v4817_v60  ;;  %v3203_v46 = vadd.f32 %v6365_v43, %v3202_v52  ;;  %v4862_v23 = vpop.permute.xlu1 %4861 }
 0x3bc   :  { %v3792_v61 = vmax.f32 %v4990_v16, 0.0  ;;  %v4992_v17 = vadd.high.f32.bf16 %v3211_v62, %v4822_v6  ;;  %v4857_v62 = vpop.permute.xlu0 %4856 }
 0x3bd   :  { %v3790_v22 = vmax.f32 %v4991_v44, 0.0  ;;  %v4993_v59 = vadd.high.f32.bf16 %v3203_v46, %v4817_v60 }
 0x3be   :  { %3856 = vst.msk [vmem:[%s6693_s6 + $0x90] sm:$0xff] %vm969_vm6, %v3792_v61  ;;  %v3793_v48 = vmax.f32 %v4992_v17, 0.0 }
 0x3bf   :  { %3854 = vst.msk [vmem:[%s6693_s6 + $0x80] sm:$0xff] %vm969_vm6, %v3790_v22  ;;  %v3791_v63 = vmax.f32 %v4993_v59, 0.0  ;;  %v4593_v21 = vpop.f32.mrb[52].mxu1 }
 0x3c0   :  { %3857 = vst.msk [vmem:[%s6693_s6 + $0x98] sm:$0xff] %vm969_vm6, %v3793_v48  ;;  %v3224_v57 = vadd.f32 %v4593_v21, %v6365_v43  ;;  %v3215_v14 = vpop.f32.mrb[53].mxu1 }
 0x3c1   :  { %3855 = vst.msk [vmem:[%s6693_s6 + $0x88] sm:$0xff] %vm969_vm6, %v3791_v63  ;;  %v3216_v13 = vadd.f32 %v6365_v43, %v3215_v14  ;;  %v4594_v55 = vpop.f32.mrb[54].mxu1 }
 0x3c2   :  { %v4994_v51 = vadd.low.f32.bf16 %v3224_v57, %v4832_v2  ;;  %v3227_v26 = vadd.f32 %v4594_v55, %v6365_v43  ;;  %v3218_v53 = vpop.f32.mrb[55].mxu1 }
 0x3c3   :  { %v4995_v38 = vadd.low.f32.bf16 %v3216_v13, %v4827_v35  ;;  %v3219_v36 = vadd.f32 %v6365_v43, %v3218_v53  ;;  %v4872_v13 = vpop.permute.xlu1 %4871 }
 0x3c4   :  { %v3796_v11 = vmax.f32 %v4994_v51, 0.0  ;;  %v4996_v50 = vadd.high.f32.bf16 %v3227_v26, %v4832_v2  ;;  %v4867_v26 = vpop.permute.xlu0 %4866 }
 0x3c5   :  { %v3794_v3 = vmax.f32 %v4995_v38, 0.0  ;;  %v4997_v10 = vadd.high.f32.bf16 %v3219_v36, %v4827_v35 }
 0x3c6   :  { %3860 = vst.msk [vmem:[%s6693_s6 + $0xb0] sm:$0xff] %vm969_vm6, %v3796_v11  ;;  %v3797_v47 = vmax.f32 %v4996_v50, 0.0 }
 0x3c7   :  { %3858 = vst.msk [vmem:[%s6693_s6 + $0xa0] sm:$0xff] %vm969_vm6, %v3794_v3  ;;  %v3795_v0 = vmax.f32 %v4997_v10, 0.0  ;;  %v4597_v9 = vpop.f32.mrb[56].mxu1 }
 0x3c8   :  { %3861 = vst.msk [vmem:[%s6693_s6 + $0xb8] sm:$0xff] %vm969_vm6, %v3797_v47  ;;  %v3240_v12 = vadd.f32 %v4597_v9, %v6365_v43  ;;  %v3231_v30 = vpop.f32.mrb[57].mxu1 }
 0x3c9   :  { %3859 = vst.msk [vmem:[%s6693_s6 + $0xa8] sm:$0xff] %vm969_vm6, %v3795_v0  ;;  %v3232_v56 = vadd.f32 %v6365_v43, %v3231_v30  ;;  %v4598_v19 = vpop.f32.mrb[58].mxu1 }
 0x3ca   :  { %v4998_v24 = vadd.low.f32.bf16 %v3240_v12, %v4842_v25  ;;  %v3243_v40 = vadd.f32 %v4598_v19, %v6365_v43  ;;  %v3234_v34 = vpop.f32.mrb[59].mxu1 }
 0x3cb   :  { %v4999_v27 = vadd.low.f32.bf16 %v3232_v56, %v4837_v7  ;;  %v3235_v58 = vadd.f32 %v6365_v43, %v3234_v34  ;;  %v4882_v56 = vpop.permute.xlu1 %4881 }
 0x3cc   :  { %v3800_v1 = vmax.f32 %v4998_v24, 0.0  ;;  %v5000_v33 = vadd.high.f32.bf16 %v3243_v40, %v4842_v25  ;;  %v4877_v40 = vpop.permute.xlu0 %4876 }
 0x3cd   :  { %v3798_v49 = vmax.f32 %v4999_v27, 0.0  ;;  %v5001_v4 = vadd.high.f32.bf16 %v3235_v58, %v4837_v7 }
 0x3ce   :  { %3864 = vst.msk [vmem:[%s6693_s6 + $0xd0] sm:$0xff] %vm969_vm6, %v3800_v1  ;;  %v3801_v39 = vmax.f32 %v5000_v33, 0.0 }
 0x3cf   :  { %3862 = vst.msk [vmem:[%s6693_s6 + $0xc0] sm:$0xff] %vm969_vm6, %v3798_v49  ;;  %v3799_v45 = vmax.f32 %v5001_v4, 0.0  ;;  %v4601_v32 = vpop.f32.mrb[60].mxu1 }
 0x3d0   :  { %3865 = vst.msk [vmem:[%s6693_s6 + $0xd8] sm:$0xff] %vm969_vm6, %v3801_v39  ;;  %v3256_v42 = vadd.f32 %v4601_v32, %v6365_v43  ;;  %v3247_v54 = vpop.f32.mrb[61].mxu1 }
 0x3d1   :  { %3863 = vst.msk [vmem:[%s6693_s6 + $0xc8] sm:$0xff] %vm969_vm6, %v3799_v45  ;;  %v3248_v6 = vadd.f32 %v6365_v43, %v3247_v54  ;;  %v4602_v5 = vpop.f32.mrb[62].mxu1 }
 0x3d2   :  { %v5002_v20 = vadd.low.f32.bf16 %v3256_v42, %v4852_v8  ;;  %v3259_v60 = vadd.f32 %v4602_v5, %v6365_v43  ;;  %v3250_v37 = vpop.f32.mrb[63].mxu1 }
 0x3d3   :  { %v5003_v41 = vadd.low.f32.bf16 %v3248_v6, %v4847_v28  ;;  %v3251_v18 = vadd.f32 %v6365_v43, %v3250_v37  ;;  %v4892_v6 = vpop.permute.xlu1 %4891 }
 0x3d4   :  { %v3804_v29 = vmax.f32 %v5002_v20, 0.0  ;;  %v5004_v15 = vadd.high.f32.bf16 %v3259_v60, %v4852_v8  ;;  %v4887_v60 = vpop.permute.xlu0 %4886 }
 0x3d5   :  { %v3802_v31 = vmax.f32 %v5003_v41, 0.0  ;;  %v5005_v16 = vadd.high.f32.bf16 %v3251_v18, %v4847_v28 }
 0x3d6   :  { %3868 = vst.msk [vmem:[%s6693_s6 + $0xf0] sm:$0xff] %vm969_vm6, %v3804_v29  ;;  %v3805_v52 = vmax.f32 %v5004_v15, 0.0 }
 0x3d7   :  { %3866 = vst.msk [vmem:[%s6693_s6 + $0xe0] sm:$0xff] %vm969_vm6, %v3802_v31  ;;  %v3803_v44 = vmax.f32 %v5005_v16, 0.0  ;;  %v4605_v46 = vpop.f32.mrb[64].mxu1 }
 0x3d8   :  { %3869 = vst.msk [vmem:[%s6693_s6 + $0xf8] sm:$0xff] %vm969_vm6, %v3805_v52  ;;  %v3272_v61 = vadd.f32 %v4605_v46, %v6365_v43  ;;  %v3263_v17 = vpop.f32.mrb[65].mxu1 }
 0x3d9   :  { %3867 = vst.msk [vmem:[%s6693_s6 + $0xe8] sm:$0xff] %vm969_vm6, %v3803_v44  ;;  %v3264_v2 = vadd.f32 %v6365_v43, %v3263_v17  ;;  %v4606_v22 = vpop.f32.mrb[66].mxu1 }
 0x3da   :  { %v5006_v59 = vadd.low.f32.bf16 %v3272_v61, %v4862_v23  ;;  %v3275_v35 = vadd.f32 %v4606_v22, %v6365_v43  ;;  %v3266_v48 = vpop.f32.mrb[67].mxu1 }
 0x3db   :  { %v5007_v63 = vadd.low.f32.bf16 %v3264_v2, %v4857_v62  ;;  %v3267_v21 = vadd.f32 %v6365_v43, %v3266_v48  ;;  %v4902_v2 = vpop.permute.xlu1 %4901 }
 0x3dc   :  { %v3808_v57 = vmax.f32 %v5006_v59, 0.0  ;;  %v5008_v14 = vadd.high.f32.bf16 %v3275_v35, %v4862_v23  ;;  %v4897_v35 = vpop.permute.xlu0 %4896 }
 0x3dd   :  { %v3806_v55 = vmax.f32 %v5007_v63, 0.0  ;;  %v5009_v51 = vadd.high.f32.bf16 %v3267_v21, %v4857_v62 }
 0x3de   :  { %3872 = vst.msk [vmem:[%s6693_s6 + $0x110] sm:$0xff] %vm969_vm6, %v3808_v57  ;;  %v3809_v53 = vmax.f32 %v5008_v14, 0.0 }
 0x3df   :  { %3870 = vst.msk [vmem:[%s6693_s6 + $0x100] sm:$0xff] %vm969_vm6, %v3806_v55  ;;  %v3807_v38 = vmax.f32 %v5009_v51, 0.0  ;;  %v4609_v36 = vpop.f32.mrb[68].mxu1 }
 0x3e0   :  { %3873 = vst.msk [vmem:[%s6693_s6 + $0x118] sm:$0xff] %vm969_vm6, %v3809_v53  ;;  %v3288_v11 = vadd.f32 %v4609_v36, %v6365_v43  ;;  %v3279_v50 = vpop.f32.mrb[69].mxu1 }
 0x3e1   :  { %3871 = vst.msk [vmem:[%s6693_s6 + $0x108] sm:$0xff] %vm969_vm6, %v3807_v38  ;;  %v3280_v25 = vadd.f32 %v6365_v43, %v3279_v50  ;;  %v4610_v3 = vpop.f32.mrb[70].mxu1 }
 0x3e2   :  { %v5010_v10 = vadd.low.f32.bf16 %v3288_v11, %v4872_v13  ;;  %v3291_v7 = vadd.f32 %v4610_v3, %v6365_v43  ;;  %v3282_v47 = vpop.f32.mrb[71].mxu1 }
 0x3e3   :  { %v5011_v0 = vadd.low.f32.bf16 %v3280_v25, %v4867_v26  ;;  %v3283_v9 = vadd.f32 %v6365_v43, %v3282_v47  ;;  %v4912_v25 = vpop.permute.xlu1 %4911 }
 0x3e4   :  { %v3812_v12 = vmax.f32 %v5010_v10, 0.0  ;;  %v5012_v30 = vadd.high.f32.bf16 %v3291_v7, %v4872_v13  ;;  %v4907_v7 = vpop.permute.xlu0 %4906 }
 0x3e5   :  { %v3810_v19 = vmax.f32 %v5011_v0, 0.0  ;;  %v5013_v24 = vadd.high.f32.bf16 %v3283_v9, %v4867_v26 }
 0x3e6   :  { %3876 = vst.msk [vmem:[%s6693_s6 + $0x130] sm:$0xff] %vm969_vm6, %v3812_v12  ;;  %v3813_v34 = vmax.f32 %v5012_v30, 0.0 }
 0x3e7   :  { %3874 = vst.msk [vmem:[%s6693_s6 + $0x120] sm:$0xff] %vm969_vm6, %v3810_v19  ;;  %v3811_v27 = vmax.f32 %v5013_v24, 0.0  ;;  %v4613_v58 = vpop.f32.mrb[72].mxu1 }
 0x3e8   :  { %3877 = vst.msk [vmem:[%s6693_s6 + $0x138] sm:$0xff] %vm969_vm6, %v3813_v34  ;;  %v3304_v1 = vadd.f32 %v4613_v58, %v6365_v43  ;;  %v3295_v33 = vpop.f32.mrb[73].mxu1 }
 0x3e9   :  { %3875 = vst.msk [vmem:[%s6693_s6 + $0x128] sm:$0xff] %vm969_vm6, %v3811_v27  ;;  %v3296_v8 = vadd.f32 %v6365_v43, %v3295_v33  ;;  %v4614_v49 = vpop.f32.mrb[74].mxu1 }
 0x3ea   :  { %v5014_v4 = vadd.low.f32.bf16 %v3304_v1, %v4882_v56  ;;  %v3307_v28 = vadd.f32 %v4614_v49, %v6365_v43  ;;  %v3298_v39 = vpop.f32.mrb[75].mxu1 }
 0x3eb   :  { %v5015_v45 = vadd.low.f32.bf16 %v3296_v8, %v4877_v40  ;;  %v3299_v32 = vadd.f32 %v6365_v43, %v3298_v39  ;;  %v4922_v8 = vpop.permute.xlu1 %4921 }
 0x3ec   :  { %v3816_v42 = vmax.f32 %v5014_v4, 0.0  ;;  %v5016_v54 = vadd.high.f32.bf16 %v3307_v28, %v4882_v56  ;;  %v4917_v28 = vpop.permute.xlu0 %4916 }
 0x3ed   :  { %v3814_v5 = vmax.f32 %v5015_v45, 0.0  ;;  %v5017_v20 = vadd.high.f32.bf16 %v3299_v32, %v4877_v40 }
 0x3ee   :  { %3880 = vst.msk [vmem:[%s6693_s6 + $0x150] sm:$0xff] %vm969_vm6, %v3816_v42  ;;  %v3817_v37 = vmax.f32 %v5016_v54, 0.0 }
 0x3ef   :  { %3878 = vst.msk [vmem:[%s6693_s6 + $0x140] sm:$0xff] %vm969_vm6, %v3814_v5  ;;  %v3815_v41 = vmax.f32 %v5017_v20, 0.0  ;;  %v4617_v18 = vpop.f32.mrb[76].mxu1 }
 0x3f0   :  { %3881 = vst.msk [vmem:[%s6693_s6 + $0x158] sm:$0xff] %vm969_vm6, %v3817_v37  ;;  %v3320_v29 = vadd.f32 %v4617_v18, %v6365_v43  ;;  %v3311_v15 = vpop.f32.mrb[77].mxu1 }
 0x3f1   :  { %3879 = vst.msk [vmem:[%s6693_s6 + $0x148] sm:$0xff] %vm969_vm6, %v3815_v41  ;;  %v3312_v23 = vadd.f32 %v6365_v43, %v3311_v15  ;;  %v4618_v31 = vpop.f32.mrb[78].mxu1 }
 0x3f2   :  { %v5018_v16 = vadd.low.f32.bf16 %v3320_v29, %v4892_v6  ;;  %v3323_v62 = vadd.f32 %v4618_v31, %v6365_v43  ;;  %v3314_v52 = vpop.f32.mrb[79].mxu1 }
 0x3f3   :  { %v5019_v44 = vadd.low.f32.bf16 %v3312_v23, %v4887_v60  ;;  %v3315_v46 = vadd.f32 %v6365_v43, %v3314_v52  ;;  %v4932_v23 = vpop.permute.xlu1 %4931 }
 0x3f4   :  { %v3820_v61 = vmax.f32 %v5018_v16, 0.0  ;;  %v5020_v17 = vadd.high.f32.bf16 %v3323_v62, %v4892_v6  ;;  %v4927_v62 = vpop.permute.xlu0 %4926 }
 0x3f5   :  { %v3818_v22 = vmax.f32 %v5019_v44, 0.0  ;;  %v5021_v59 = vadd.high.f32.bf16 %v3315_v46, %v4887_v60 }
 0x3f6   :  { %3884 = vst.msk [vmem:[%s6693_s6 + $0x170] sm:$0xff] %vm969_vm6, %v3820_v61  ;;  %v3821_v48 = vmax.f32 %v5020_v17, 0.0 }
 0x3f7   :  { %3882 = vst.msk [vmem:[%s6693_s6 + $0x160] sm:$0xff] %vm969_vm6, %v3818_v22  ;;  %v3819_v63 = vmax.f32 %v5021_v59, 0.0  ;;  %v4621_v21 = vpop.f32.mrb[80].mxu1 }
 0x3f8   :  { %3885 = vst.msk [vmem:[%s6693_s6 + $0x178] sm:$0xff] %vm969_vm6, %v3821_v48  ;;  %v3336_v57 = vadd.f32 %v4621_v21, %v6365_v43  ;;  %v3327_v14 = vpop.f32.mrb[81].mxu1 }
 0x3f9   :  { %3883 = vst.msk [vmem:[%s6693_s6 + $0x168] sm:$0xff] %vm969_vm6, %v3819_v63  ;;  %v3328_v13 = vadd.f32 %v6365_v43, %v3327_v14  ;;  %v4622_v55 = vpop.f32.mrb[82].mxu1 }
 0x3fa   :  { %v5022_v51 = vadd.low.f32.bf16 %v3336_v57, %v4902_v2  ;;  %v3339_v26 = vadd.f32 %v4622_v55, %v6365_v43  ;;  %v3330_v53 = vpop.f32.mrb[83].mxu1 }
 0x3fb   :  { %v5023_v38 = vadd.low.f32.bf16 %v3328_v13, %v4897_v35  ;;  %v3331_v36 = vadd.f32 %v6365_v43, %v3330_v53 }
 0x3fc   :  { %v3824_v11 = vmax.f32 %v5022_v51, 0.0  ;;  %v5024_v50 = vadd.high.f32.bf16 %v3339_v26, %v4902_v2 }
 0x3fd   :  { %v3822_v3 = vmax.f32 %v5023_v38, 0.0  ;;  %v5025_v10 = vadd.high.f32.bf16 %v3331_v36, %v4897_v35 }
 0x3fe   :  { %3888 = vst.msk [vmem:[%s6693_s6 + $0x190] sm:$0xff] %vm969_vm6, %v3824_v11  ;;  %v3825_v47 = vmax.f32 %v5024_v50, 0.0 }
 0x3ff   :  { %3886 = vst.msk [vmem:[%s6693_s6 + $0x180] sm:$0xff] %vm969_vm6, %v3822_v3  ;;  %v3823_v0 = vmax.f32 %v5025_v10, 0.0  ;;  %v4625_v9 = vpop.f32.mrb[84].mxu1 }
 0x400   :  { %3889 = vst.msk [vmem:[%s6693_s6 + $0x198] sm:$0xff] %vm969_vm6, %v3825_v47  ;;  %v3352_v12 = vadd.f32 %v4625_v9, %v6365_v43  ;;  %v3343_v30 = vpop.f32.mrb[85].mxu1 }
 0x401   :  { %3887 = vst.msk [vmem:[%s6693_s6 + $0x188] sm:$0xff] %vm969_vm6, %v3823_v0  ;;  %v3344_v56 = vadd.f32 %v6365_v43, %v3343_v30  ;;  %v4626_v19 = vpop.f32.mrb[86].mxu1 }
 0x402   :  { %v5026_v24 = vadd.low.f32.bf16 %v3352_v12, %v4912_v25  ;;  %v3355_v40 = vadd.f32 %v4626_v19, %v6365_v43  ;;  %v3346_v34 = vpop.f32.mrb[87].mxu1 }
 0x403   :  { %v5027_v27 = vadd.low.f32.bf16 %v3344_v56, %v4907_v7  ;;  %v3347_v58 = vadd.f32 %v6365_v43, %v3346_v34 }
 0x404   :  { %v3828_v1 = vmax.f32 %v5026_v24, 0.0  ;;  %v5028_v33 = vadd.high.f32.bf16 %v3355_v40, %v4912_v25 }
 0x405   :  { %v3826_v49 = vmax.f32 %v5027_v27, 0.0  ;;  %v5029_v4 = vadd.high.f32.bf16 %v3347_v58, %v4907_v7 }
 0x406   :  { %3892 = vst.msk [vmem:[%s6693_s6 + $0x1b0] sm:$0xff] %vm969_vm6, %v3828_v1  ;;  %v3829_v39 = vmax.f32 %v5028_v33, 0.0 }
 0x407   :  { %3890 = vst.msk [vmem:[%s6693_s6 + $0x1a0] sm:$0xff] %vm969_vm6, %v3826_v49  ;;  %v3827_v45 = vmax.f32 %v5029_v4, 0.0  ;;  %v4629_v32 = vpop.f32.mrb[88].mxu1 }
 0x408   :  { %3893 = vst.msk [vmem:[%s6693_s6 + $0x1b8] sm:$0xff] %vm969_vm6, %v3829_v39  ;;  %v3368_v42 = vadd.f32 %v4629_v32, %v6365_v43  ;;  %v3359_v54 = vpop.f32.mrb[89].mxu1 }
 0x409   :  { %3891 = vst.msk [vmem:[%s6693_s6 + $0x1a8] sm:$0xff] %vm969_vm6, %v3827_v45  ;;  %v3360_v6 = vadd.f32 %v6365_v43, %v3359_v54  ;;  %v4630_v5 = vpop.f32.mrb[90].mxu1 }
 0x40a   :  { %v5030_v20 = vadd.low.f32.bf16 %v3368_v42, %v4922_v8  ;;  %v3371_v60 = vadd.f32 %v4630_v5, %v6365_v43  ;;  %v3362_v37 = vpop.f32.mrb[91].mxu1 }
 0x40b   :  { %v5031_v41 = vadd.low.f32.bf16 %v3360_v6, %v4917_v28  ;;  %v3363_v18 = vadd.f32 %v6365_v43, %v3362_v37 }
 0x40c   :  { %v3832_v29 = vmax.f32 %v5030_v20, 0.0  ;;  %v5032_v15 = vadd.high.f32.bf16 %v3371_v60, %v4922_v8 }
 0x40d   :  { %v3830_v31 = vmax.f32 %v5031_v41, 0.0  ;;  %v5033_v16 = vadd.high.f32.bf16 %v3363_v18, %v4917_v28 }
 0x40e   :  { %3896 = vst.msk [vmem:[%s6693_s6 + $0x1d0] sm:$0xff] %vm969_vm6, %v3832_v29  ;;  %v3833_v52 = vmax.f32 %v5032_v15, 0.0 }
 0x40f   :  { %3894 = vst.msk [vmem:[%s6693_s6 + $0x1c0] sm:$0xff] %vm969_vm6, %v3830_v31  ;;  %v3831_v44 = vmax.f32 %v5033_v16, 0.0  ;;  %v4633_v46 = vpop.f32.mrb[92].mxu1 }
 0x410   :  { %3897 = vst.msk [vmem:[%s6693_s6 + $0x1d8] sm:$0xff] %vm969_vm6, %v3833_v52  ;;  %v3384_v61 = vadd.f32 %v4633_v46, %v6365_v43  ;;  %v3375_v17 = vpop.f32.mrb[93].mxu1 }
 0x411   :  { %3895 = vst.msk [vmem:[%s6693_s6 + $0x1c8] sm:$0xff] %vm969_vm6, %v3831_v44  ;;  %v3376_v2 = vadd.f32 %v6365_v43, %v3375_v17  ;;  %v4634_v22 = vpop.f32.mrb[94].mxu1 }
 0x412   :  { %v5034_v59 = vadd.low.f32.bf16 %v3384_v61, %v4932_v23  ;;  %v3387_v35 = vadd.f32 %v4634_v22, %v6365_v43  ;;  %v3378_v48 = vpop.f32.mrb[95].mxu1 }
 0x413   :  { %v5035_v63 = vadd.low.f32.bf16 %v3376_v2, %v4927_v62  ;;  %v3379_v21 = vadd.f32 %v6365_v43, %v3378_v48 }
 0x414   :  { %v3836_v57 = vmax.f32 %v5034_v59, 0.0  ;;  %v5036_v14 = vadd.high.f32.bf16 %v3387_v35, %v4932_v23 }
 0x415   :  { %v3834_v13 = vmax.f32 %v5035_v63, 0.0  ;;  %v5037_v55 = vadd.high.f32.bf16 %v3379_v21, %v4927_v62 }
 0x416   :  { %3900 = vst.msk [vmem:[%s6693_s6 + $0x1f0] sm:$0xff] %vm969_vm6, %v3836_v57  ;;  %v3837_v51 = vmax.f32 %v5036_v14, 0.0 }
 0x417   :  { %3898 = vst.msk [vmem:[%s6693_s6 + $0x1e0] sm:$0xff] %vm969_vm6, %v3834_v13  ;;  %v3835_v26 = vmax.f32 %v5037_v55, 0.0 }
 0x418   :  { %3901 = vst.msk [vmem:[%s6693_s6 + $0x1f8] sm:$0xff] %vm969_vm6, %v3837_v51 }
 0x419   :  { %3899 = vst.msk [vmem:[%s6693_s6 + $0x1e8] sm:$0xff] %vm969_vm6, %v3835_v26 }

</bundles_post_ra>
